<compile_context>
chip_gen: v7x
topology: tpu7x:2x2x1
jax: 0.10.0
libtpu: 0.0.40
codegen_flags: <defaults>
</compile_context>

<pallas_src>
import numpy as np
import jax
import jax.numpy as jnp
from jax import lax
from jax.experimental import pallas as pl
from jax.experimental.pallas import tpu as pltpu

# ----------------------------- model dims -----------------------------------
INPUT_DIM = 16    # src vocab size  (== emb_dim, required by the module)
OUTPUT_DIM = 16   # trg vocab size  (== emb_dim, required by the module)
EMB_DIM = 16
HID_DIM = 32
PAD_IDX = 0
B = 2             # batch
S_SRC = 8         # src sequence length
T_TRG = 8         # trg sequence length

H = HID_DIM
H3 = 3 * HID_DIM
E = EMB_DIM
V = OUTPUT_DIM


# ------------------ GRU step with hoisted input projection -------------------
def _gru_step(gi, h, w_hh_t, b_hh_b):
    """PyTorch nn.GRU cell (gates r, z, n). gi = x @ W_ih^T + b_ih is
    precomputed outside the recurrent loop; b_hh_b is pre-broadcast [B, 3H]."""
    gh = jnp.dot(h, w_hh_t, preferred_element_type=jnp.float32) + b_hh_b
    r = jax.nn.sigmoid(gi[:, 0:H] + gh[:, 0:H])
    z = jax.nn.sigmoid(gi[:, H:2 * H] + gh[:, H:2 * H])
    n = jnp.tanh(gi[:, 2 * H:] + r * gh[:, 2 * H:])
    return (1.0 - z) * n + z * h


# ----------------------------- Pallas kernel ---------------------------------
def seq2seq_kernel(tf_ref,      # SMEM [T] int32 : per-step teacher-force flags
                   emb_ref,     # VMEM [S*B + T*B + V, E] : emb_src | emb_trg_teacher | emb_trg_tbl
                   w_ref,       # VMEM [2E+2H, 3H] : e_wih_t | e_whh_t | d_wih_t | d_whh_t
                   b_ref,       # VMEM [4, 3H]     : e_bih | e_bhh | d_bih | d_bhh
                   fc_ref,      # VMEM [H+1, V]    : fc_w_t | fc_b
                   out_ref,     # VMEM [B, T*V]    : lane-dense batch-first output
                   gi_in_ref):  # VMEM scratch [B, 3H] : next decoder input projection
    Bk = B
    S = S_SRC
    T = T_TRG

    # -------- unpack the concatenated parameter buffers (static slices) --------
    w = w_ref[...]
    e_wih = w[0:E]                          # [E, 3H]
    e_whh = w[E:E + H]                      # [H, 3H]
    d_wih = w[E + H:2 * E + H]              # [E, 3H]
    d_whh = w[2 * E + H:2 * E + 2 * H]      # [H, 3H]

    b = b_ref[...]
    e_bih = b[0:1]
    e_bhh = b[1:2]
    d_bih = b[2:3]
    d_bhh = b[3:4]

    fcb = fc_ref[...]
    fc_w = fcb[0:H]                         # [H, V]
    fc_b = fcb[H:H + 1]                     # [1, V]

    emb = emb_ref[...]
    emb_src = emb[0:S * Bk]                 # [S*B, E]  time-major flattened
    emb_tea = emb[S * Bk:(S + T) * Bk]      # [T*B, E]
    emb_tbl = emb[(S + T) * Bk:(S + T) * Bk + V]   # [V, E]

    # Hoisted bias broadcasts (JAX does not CSE broadcast_in_dim).
    e_bhh_b = jnp.broadcast_to(e_bhh, (Bk, H3))
    d_bhh_b = jnp.broadcast_to(d_bhh, (Bk, H3))
    fc_b_b = jnp.broadcast_to(fc_b, (Bk, V))

    # ---- hoisted input projections: one matmul each, off the serial path ------
    gi_src = jnp.dot(emb_src, e_wih, preferred_element_type=jnp.float32) + e_bih   # [S*B, 3H]
    gi_tea = jnp.dot(emb_tea, d_wih, preferred_element_type=jnp.float32) + d_bih   # [T*B, 3H]
    # decoder embedding table pre-multiplied by W_ih^T, with d_bih folded in
    # (exact: each greedy one-hot row sums to 1).
    emb_proj = jnp.dot(emb_tbl, d_wih, preferred_element_type=jnp.float32) + d_bih  # [V, 3H]

    # ------------- encoder: only the h-recurrence matmul per step --------------
    h = jnp.zeros((Bk, H), jnp.float32)
    for s in range(S):                        # fully unrolled, static slices
        h = _gru_step(gi_src[s * Bk:(s + 1) * Bk], h, e_whh, e_bhh_b)

    # ------------- decoder: autoregressive loop with teacher forcing -----------
    gi_in_ref[...] = gi_tea[0:Bk]             # first decoder input is trg[:, 0]
    hs = []                                   # carried hidden states (unrolled vregs)
    for t in range(1, T):                     # fully unrolled
        h = _gru_step(gi_in_ref[...], h, d_whh, d_bhh_b)
        hs.append(h)

        if t < T - 1:                         # last step's next-input is unused
            # default (teacher-forced) next input: precomputed projection of trg[:, t]
            gi_in_ref[...] = gi_tea[t * Bk:(t + 1) * Bk]

            @pl.when(tf_ref[t] == 0)          # greedy only: pred -> argmax -> one-hot -> gi
            def _():
                pred = jnp.dot(h, fc_w, preferred_element_type=jnp.float32) + fc_b_b
                iota = lax.broadcasted_iota(jnp.int32, (Bk, V), 1)
                mx = jnp.max(pred, axis=-1, keepdims=True)
                cand = jnp.where(pred == mx, iota, V)
                top1 = jnp.min(cand, axis=-1, keepdims=True)     # first-max tie break
                onehot = (iota == top1).astype(jnp.float32)      # [B, V]
                gi_in_ref[...] = jnp.dot(onehot, emb_proj,
                                         preferred_element_type=jnp.float32)

    # ---- fc_out for all steps at once, off the recurrence chain; single store ----
    preds = [jnp.zeros((Bk, V), jnp.float32)]                    # outputs[:, 0] stays zero
    for ht in hs:
        preds.append(jnp.dot(ht, fc_w, preferred_element_type=jnp.float32) + fc_b_b)
    out_ref[...] = jnp.concatenate(preds, axis=1)                # [B, T*V] lane-dense


# ----------------------------- param packing ---------------------------------
def pack_params(params):
    """Concatenate the 12 small parameter arrays into 3 padded VMEM buffers
    (8-row-aligned offsets) so the kernel entry makes 4 DMAs instead of 13."""
    gru_w = jnp.concatenate([params["e_wih_t"], params["e_whh_t"],
                             params["d_wih_t"], params["d_whh_t"]], axis=0)   # [2E+2H, 3H]
    gru_b = jnp.concatenate([params["e_bih"], params["e_bhh"],
                             params["d_bih"], params["d_bhh"]], axis=0)        # [4, 3H]
    fc_buf = jnp.concatenate([params["fc_w_t"], params["fc_b"]], axis=0)       # [H+1, V]
    return {
        "gru_w": gru_w.astype(jnp.float32),
        "gru_b": gru_b.astype(jnp.float32),
        "fc_buf": fc_buf.astype(jnp.float32),
        "emb_src_tbl": params["emb_src_tbl"].astype(jnp.float32),
        "emb_trg_tbl": params["emb_trg_tbl"].astype(jnp.float32),
    }


# ----------------------------- wrapper ---------------------------------------
@jax.jit
def seq2seq_vanilla(src, trg, packed, tf_flags):
    """src, trg: int32 [B, S] / [B, T] token ids. Returns [B, T, OUTPUT_DIM] f32."""
    # embedding gathers + time-major flatten + concat: layout plumbing, fused by jit
    emb_src = jnp.transpose(packed["emb_src_tbl"][src], (1, 0, 2)).reshape(S_SRC * B, E)
    emb_tea = jnp.transpose(packed["emb_trg_tbl"][trg], (1, 0, 2)).reshape(T_TRG * B, E)
    emb_buf = jnp.concatenate([emb_src, emb_tea, packed["emb_trg_tbl"]], axis=0)  # [48, E]

    vmem = pl.BlockSpec(memory_space=pltpu.MemorySpace.VMEM)
    smem = pl.BlockSpec(memory_space=pltpu.MemorySpace.SMEM)

    out = pl.pallas_call(
        seq2seq_kernel,
        out_shape=jax.ShapeDtypeStruct((B, T_TRG * OUTPUT_DIM), jnp.float32),
        in_specs=[smem, vmem, vmem, vmem, vmem],
        out_specs=vmem,
        scratch_shapes=[pltpu.VMEM((B, H3), jnp.float32)],
    )(
        tf_flags.astype(jnp.int32),
        emb_buf.astype(jnp.float32),
        packed["gru_w"], packed["gru_b"], packed["fc_buf"],
    )
    return out.reshape(B, T_TRG, OUTPUT_DIM)      # lane-dense kernel output, cheap reshape


# ----------------------------- pure-JAX reference ----------------------------
def reference(src, trg, params, tf_flags):
    def gru_cell(x, h, w_ih_t, w_hh_t, b_ih, b_hh):
        gi = x @ w_ih_t + b_ih
        gh = h @ w_hh_t + b_hh
        r = jax.nn.sigmoid(gi[:, 0:H] + gh[:, 0:H])
        z = jax.nn.sigmoid(gi[:, H:2 * H] + gh[:, H:2 * H])
        n = jnp.tanh(gi[:, 2 * H:] + r * gh[:, 2 * H:])
        return (1.0 - z) * n + z * h

    emb_src = params["emb_src_tbl"][src]                       # [B, S, E]
    h = jnp.zeros((B, HID_DIM), jnp.float32)
    for s in range(S_SRC):
        h = gru_cell(emb_src[:, s], h,
                     params["e_wih_t"], params["e_whh_t"], params["e_bih"], params["e_bhh"])

    outputs = [jnp.zeros((B, OUTPUT_DIM), jnp.float32)]
    emb_in = params["emb_trg_tbl"][trg[:, 0]]
    for t in range(1, T_TRG):
        h = gru_cell(emb_in, h,
                     params["d_wih_t"], params["d_whh_t"], params["d_bih"], params["d_bhh"])
        pred = h @ params["fc_w_t"] + params["fc_b"]
        outputs.append(pred)
        top1 = jnp.argmax(pred, axis=1)
        next_tok = jnp.where(tf_flags[t] != 0, trg[:, t], top1)
        emb_in = params["emb_trg_tbl"][next_tok]
    return jnp.stack(outputs, axis=1)                          # [B, T, V_out]


# ----------------------------- param init ------------------------------------
def init_params(key):
    ks = jax.random.split(key, 16)
    u = lambda k, s, sc=0.1: jax.random.uniform(k, s, jnp.float32, -sc, sc)

    emb_src_tbl = u(ks[0], (INPUT_DIM, EMB_DIM)).at[PAD_IDX].set(0.0)
    emb_trg_tbl = u(ks[1], (OUTPUT_DIM, EMB_DIM)).at[PAD_IDX].set(0.0)

    return {
        "emb_src_tbl": emb_src_tbl,
        "emb_trg_tbl": emb_trg_tbl,
        # encoder GRU (input size = INPUT_DIM == EMB_DIM), weights pre-transposed
        "e_wih_t": u(ks[2], (INPUT_DIM, H3)),
        "e_whh_t": u(ks[3], (HID_DIM, H3)),
        "e_bih":   u(ks[4], (1, H3)),
        "e_bhh":   u(ks[5], (1, H3)),
        # decoder GRU (input size = OUTPUT_DIM == EMB_DIM)
        "d_wih_t": u(ks[6], (OUTPUT_DIM, H3)),
        "d_whh_t": u(ks[7], (HID_DIM, H3)),
        "d_bih":   u(ks[8], (1, H3)),
        "d_bhh":   u(ks[9], (1, H3)),
        # fc_out
        "fc_w_t":  u(ks[10], (HID_DIM, OUTPUT_DIM)),
        "fc_b":    u(ks[11], (1, OUTPUT_DIM)),
    }


# ----------------------------- main -------------------------------------------
if __name__ == "__main__":
    key = jax.random.PRNGKey(0)
    k_par, k_src, k_trg, k_tf = jax.random.split(key, 4)

    params = init_params(k_par)
    packed = pack_params(params)
    src = jax.random.randint(k_src, (B, S_SRC), 1, INPUT_DIM, dtype=jnp.int32)
    trg = jax.random.randint(k_trg, (B, T_TRG), 1, OUTPUT_DIM, dtype=jnp.int32)
    # deterministic replacement for torch.rand(1) < teacher_forcing_ratio (ratio=0.5)
    tf_flags = (jax.random.uniform(k_tf, (T_TRG,)) < 0.5).astype(jnp.int32)

    out = seq2seq_vanilla(src, trg, packed, tf_flags)
    out = jax.block_until_ready(out)

    ref = reference(src, trg, params, tf_flags)
    np.testing.assert_allclose(np.asarray(out), np.asarray(ref), rtol=1e-4, atol=1e-4)
    assert out.shape == (B, T_TRG, OUTPUT_DIM)

    print("KERNEL_OK")
</pallas_src>

<mosaic_0001>
module attributes {stable_mosaic.version = 11 : i64} {
  func.func @seq2seq_kernel(%arg0: memref<8xi32, #tpu.memory_space<smem>>, %arg1: memref<48x16xf32, #tpu.memory_space<vmem>>, %arg2: memref<96x96xf32, #tpu.memory_space<vmem>>, %arg3: memref<4x96xf32, #tpu.memory_space<vmem>>, %arg4: memref<33x16xf32, #tpu.memory_space<vmem>>, %arg5: memref<2x128xf32, #tpu.memory_space<vmem>>, %arg6: memref<2x96xf32, #tpu.memory_space<vmem>>) attributes {dimension_semantics = [], scalar_prefetch = 0 : i64, scratch_operands = 1 : i64, tpu.core_type = #tpu.core_type<tc>} {
    %c0 = arith.constant 0 : index
    %c0_0 = arith.constant 0 : index
    %0 = vector.load %arg2[%c0, %c0_0] : memref<96x96xf32, #tpu.memory_space<vmem>>, vector<96x96xf32>
    %1 = vector.extract_strided_slice %0 {offsets = [0, 0], sizes = [16, 96], strides = [1, 1]} : vector<96x96xf32> to vector<16x96xf32>
    %2 = vector.extract_strided_slice %0 {offsets = [16, 0], sizes = [32, 96], strides = [1, 1]} : vector<96x96xf32> to vector<32x96xf32>
    %3 = vector.extract_strided_slice %0 {offsets = [48, 0], sizes = [16, 96], strides = [1, 1]} : vector<96x96xf32> to vector<16x96xf32>
    %4 = vector.extract_strided_slice %0 {offsets = [64, 0], sizes = [32, 96], strides = [1, 1]} : vector<96x96xf32> to vector<32x96xf32>
    %c0_1 = arith.constant 0 : index
    %c0_2 = arith.constant 0 : index
    %5 = vector.load %arg3[%c0_1, %c0_2] : memref<4x96xf32, #tpu.memory_space<vmem>>, vector<4x96xf32>
    %6 = vector.extract_strided_slice %5 {offsets = [0, 0], sizes = [1, 96], strides = [1, 1]} : vector<4x96xf32> to vector<1x96xf32>
    %7 = vector.extract_strided_slice %5 {offsets = [1, 0], sizes = [1, 96], strides = [1, 1]} : vector<4x96xf32> to vector<1x96xf32>
    %8 = vector.extract_strided_slice %5 {offsets = [2, 0], sizes = [1, 96], strides = [1, 1]} : vector<4x96xf32> to vector<1x96xf32>
    %9 = vector.extract_strided_slice %5 {offsets = [3, 0], sizes = [1, 96], strides = [1, 1]} : vector<4x96xf32> to vector<1x96xf32>
    %c0_3 = arith.constant 0 : index
    %c0_4 = arith.constant 0 : index
    %10 = vector.load %arg4[%c0_3, %c0_4] : memref<33x16xf32, #tpu.memory_space<vmem>>, vector<33x16xf32>
    %11 = vector.extract_strided_slice %10 {offsets = [0, 0], sizes = [32, 16], strides = [1, 1]} : vector<33x16xf32> to vector<32x16xf32>
    %12 = vector.extract_strided_slice %10 {offsets = [32, 0], sizes = [1, 16], strides = [1, 1]} : vector<33x16xf32> to vector<1x16xf32>
    %c0_5 = arith.constant 0 : index
    %c0_6 = arith.constant 0 : index
    %13 = vector.load %arg1[%c0_5, %c0_6] : memref<48x16xf32, #tpu.memory_space<vmem>>, vector<48x16xf32>
    %14 = vector.extract_strided_slice %13 {offsets = [0, 0], sizes = [16, 16], strides = [1, 1]} : vector<48x16xf32> to vector<16x16xf32>
    %15 = vector.extract_strided_slice %13 {offsets = [16, 0], sizes = [16, 16], strides = [1, 1]} : vector<48x16xf32> to vector<16x16xf32>
    %16 = vector.extract_strided_slice %13 {offsets = [32, 0], sizes = [16, 16], strides = [1, 1]} : vector<48x16xf32> to vector<16x16xf32>
    %17 = vector.shape_cast %7 : vector<1x96xf32> to vector<1x96xf32>
    %18 = vector.broadcast %17 : vector<1x96xf32> to vector<2x96xf32>
    %19 = vector.shape_cast %9 : vector<1x96xf32> to vector<1x96xf32>
    %20 = vector.broadcast %19 : vector<1x96xf32> to vector<2x96xf32>
    %21 = vector.shape_cast %12 : vector<1x16xf32> to vector<1x16xf32>
    %22 = vector.broadcast %21 : vector<1x16xf32> to vector<2x16xf32>
    %cst = arith.constant dense<0.000000e+00> : vector<16x96xf32>
    %23 = tpu.matmul %14, %1, %cst {dimension_numbers = #tpu.dot_dimension_numbers<[1], [0], [0], [1], [0, 0, 1, 1], [], []>} : vector<16x16xf32>, vector<16x96xf32>, vector<16x96xf32> -> vector<16x96xf32>
    %24 = vector.broadcast %6 : vector<1x96xf32> to vector<16x96xf32>
    %25 = arith.addf %23, %24 : vector<16x96xf32>
    %cst_7 = arith.constant dense<0.000000e+00> : vector<16x96xf32>
    %26 = tpu.matmul %15, %3, %cst_7 {dimension_numbers = #tpu.dot_dimension_numbers<[1], [0], [0], [1], [0, 0, 1, 1], [], []>} : vector<16x16xf32>, vector<16x96xf32>, vector<16x96xf32> -> vector<16x96xf32>
    %27 = vector.broadcast %8 : vector<1x96xf32> to vector<16x96xf32>
    %28 = arith.addf %26, %27 : vector<16x96xf32>
    %cst_8 = arith.constant dense<0.000000e+00> : vector<16x96xf32>
    %29 = tpu.matmul %16, %3, %cst_8 {dimension_numbers = #tpu.dot_dimension_numbers<[1], [0], [0], [1], [0, 0, 1, 1], [], []>} : vector<16x16xf32>, vector<16x96xf32>, vector<16x96xf32> -> vector<16x96xf32>
    %30 = vector.broadcast %8 : vector<1x96xf32> to vector<16x96xf32>
    %31 = arith.addf %29, %30 : vector<16x96xf32>
    %cst_9 = arith.constant 0.000000e+00 : f32
    %32 = vector.broadcast %cst_9 : f32 to vector<2x32xf32>
    %33 = vector.extract_strided_slice %25 {offsets = [0, 0], sizes = [2, 96], strides = [1, 1]} : vector<16x96xf32> to vector<2x96xf32>
    %cst_10 = arith.constant dense<0.000000e+00> : vector<2x96xf32>
    %34 = tpu.matmul %32, %2, %cst_10 {dimension_numbers = #tpu.dot_dimension_numbers<[1], [0], [0], [1], [0, 0, 1, 1], [], []>} : vector<2x32xf32>, vector<32x96xf32>, vector<2x96xf32> -> vector<2x96xf32>
    %35 = arith.addf %34, %18 : vector<2x96xf32>
    %36 = vector.extract_strided_slice %33 {offsets = [0, 0], sizes = [2, 32], strides = [1, 1]} : vector<2x96xf32> to vector<2x32xf32>
    %37 = vector.extract_strided_slice %35 {offsets = [0, 0], sizes = [2, 32], strides = [1, 1]} : vector<2x96xf32> to vector<2x32xf32>
    %38 = arith.addf %36, %37 : vector<2x32xf32>
    %39 = arith.negf %38 : vector<2x32xf32>
    %40 = math.exp %39 : vector<2x32xf32>
    %cst_11 = arith.constant 1.000000e+00 : f32
    %41 = vector.broadcast %cst_11 : f32 to vector<2x32xf32>
    %42 = arith.addf %41, %40 : vector<2x32xf32>
    %43 = arith.divf %41, %42 : vector<2x32xf32>
    %44 = vector.extract_strided_slice %33 {offsets = [0, 32], sizes = [2, 32], strides = [1, 1]} : vector<2x96xf32> to vector<2x32xf32>
    %45 = vector.extract_strided_slice %35 {offsets = [0, 32], sizes = [2, 32], strides = [1, 1]} : vector<2x96xf32> to vector<2x32xf32>
    %46 = arith.addf %44, %45 : vector<2x32xf32>
    %47 = arith.negf %46 : vector<2x32xf32>
    %48 = math.exp %47 : vector<2x32xf32>
    %cst_12 = arith.constant 1.000000e+00 : f32
    %49 = vector.broadcast %cst_12 : f32 to vector<2x32xf32>
    %50 = arith.addf %49, %48 : vector<2x32xf32>
    %51 = arith.divf %49, %50 : vector<2x32xf32>
    %52 = vector.extract_strided_slice %33 {offsets = [0, 64], sizes = [2, 32], strides = [1, 1]} : vector<2x96xf32> to vector<2x32xf32>
    %53 = vector.extract_strided_slice %35 {offsets = [0, 64], sizes = [2, 32], strides = [1, 1]} : vector<2x96xf32> to vector<2x32xf32>
    %54 = arith.mulf %43, %53 : vector<2x32xf32>
    %55 = arith.addf %52, %54 : vector<2x32xf32>
    %56 = math.tanh %55 : vector<2x32xf32>
    %cst_13 = arith.constant 1.000000e+00 : f32
    %57 = vector.broadcast %cst_13 : f32 to vector<2x32xf32>
    %58 = arith.subf %57, %51 : vector<2x32xf32>
    %59 = arith.mulf %58, %56 : vector<2x32xf32>
    %60 = arith.mulf %51, %32 : vector<2x32xf32>
    %61 = arith.addf %59, %60 : vector<2x32xf32>
    %62 = vector.extract_strided_slice %25 {offsets = [2, 0], sizes = [2, 96], strides = [1, 1]} : vector<16x96xf32> to vector<2x96xf32>
    %cst_14 = arith.constant dense<0.000000e+00> : vector<2x96xf32>
    %63 = tpu.matmul %61, %2, %cst_14 {dimension_numbers = #tpu.dot_dimension_numbers<[1], [0], [0], [1], [0, 0, 1, 1], [], []>} : vector<2x32xf32>, vector<32x96xf32>, vector<2x96xf32> -> vector<2x96xf32>
    %64 = arith.addf %63, %18 : vector<2x96xf32>
    %65 = vector.extract_strided_slice %62 {offsets = [0, 0], sizes = [2, 32], strides = [1, 1]} : vector<2x96xf32> to vector<2x32xf32>
    %66 = vector.extract_strided_slice %64 {offsets = [0, 0], sizes = [2, 32], strides = [1, 1]} : vector<2x96xf32> to vector<2x32xf32>
    %67 = arith.addf %65, %66 : vector<2x32xf32>
    %68 = arith.negf %67 : vector<2x32xf32>
    %69 = math.exp %68 : vector<2x32xf32>
    %cst_15 = arith.constant 1.000000e+00 : f32
    %70 = vector.broadcast %cst_15 : f32 to vector<2x32xf32>
    %71 = arith.addf %70, %69 : vector<2x32xf32>
    %72 = arith.divf %70, %71 : vector<2x32xf32>
    %73 = vector.extract_strided_slice %62 {offsets = [0, 32], sizes = [2, 32], strides = [1, 1]} : vector<2x96xf32> to vector<2x32xf32>
    %74 = vector.extract_strided_slice %64 {offsets = [0, 32], sizes = [2, 32], strides = [1, 1]} : vector<2x96xf32> to vector<2x32xf32>
    %75 = arith.addf %73, %74 : vector<2x32xf32>
    %76 = arith.negf %75 : vector<2x32xf32>
    %77 = math.exp %76 : vector<2x32xf32>
    %cst_16 = arith.constant 1.000000e+00 : f32
    %78 = vector.broadcast %cst_16 : f32 to vector<2x32xf32>
    %79 = arith.addf %78, %77 : vector<2x32xf32>
    %80 = arith.divf %78, %79 : vector<2x32xf32>
    %81 = vector.extract_strided_slice %62 {offsets = [0, 64], sizes = [2, 32], strides = [1, 1]} : vector<2x96xf32> to vector<2x32xf32>
    %82 = vector.extract_strided_slice %64 {offsets = [0, 64], sizes = [2, 32], strides = [1, 1]} : vector<2x96xf32> to vector<2x32xf32>
    %83 = arith.mulf %72, %82 : vector<2x32xf32>
    %84 = arith.addf %81, %83 : vector<2x32xf32>
    %85 = math.tanh %84 : vector<2x32xf32>
    %cst_17 = arith.constant 1.000000e+00 : f32
    %86 = vector.broadcast %cst_17 : f32 to vector<2x32xf32>
    %87 = arith.subf %86, %80 : vector<2x32xf32>
    %88 = arith.mulf %87, %85 : vector<2x32xf32>
    %89 = arith.mulf %80, %61 : vector<2x32xf32>
    %90 = arith.addf %88, %89 : vector<2x32xf32>
    %91 = vector.extract_strided_slice %25 {offsets = [4, 0], sizes = [2, 96], strides = [1, 1]} : vector<16x96xf32> to vector<2x96xf32>
    %cst_18 = arith.constant dense<0.000000e+00> : vector<2x96xf32>
    %92 = tpu.matmul %90, %2, %cst_18 {dimension_numbers = #tpu.dot_dimension_numbers<[1], [0], [0], [1], [0, 0, 1, 1], [], []>} : vector<2x32xf32>, vector<32x96xf32>, vector<2x96xf32> -> vector<2x96xf32>
    %93 = arith.addf %92, %18 : vector<2x96xf32>
    %94 = vector.extract_strided_slice %91 {offsets = [0, 0], sizes = [2, 32], strides = [1, 1]} : vector<2x96xf32> to vector<2x32xf32>
    %95 = vector.extract_strided_slice %93 {offsets = [0, 0], sizes = [2, 32], strides = [1, 1]} : vector<2x96xf32> to vector<2x32xf32>
    %96 = arith.addf %94, %95 : vector<2x32xf32>
    %97 = arith.negf %96 : vector<2x32xf32>
    %98 = math.exp %97 : vector<2x32xf32>
    %cst_19 = arith.constant 1.000000e+00 : f32
    %99 = vector.broadcast %cst_19 : f32 to vector<2x32xf32>
    %100 = arith.addf %99, %98 : vector<2x32xf32>
    %101 = arith.divf %99, %100 : vector<2x32xf32>
    %102 = vector.extract_strided_slice %91 {offsets = [0, 32], sizes = [2, 32], strides = [1, 1]} : vector<2x96xf32> to vector<2x32xf32>
    %103 = vector.extract_strided_slice %93 {offsets = [0, 32], sizes = [2, 32], strides = [1, 1]} : vector<2x96xf32> to vector<2x32xf32>
    %104 = arith.addf %102, %103 : vector<2x32xf32>
    %105 = arith.negf %104 : vector<2x32xf32>
    %106 = math.exp %105 : vector<2x32xf32>
    %cst_20 = arith.constant 1.000000e+00 : f32
    %107 = vector.broadcast %cst_20 : f32 to vector<2x32xf32>
    %108 = arith.addf %107, %106 : vector<2x32xf32>
    %109 = arith.divf %107, %108 : vector<2x32xf32>
    %110 = vector.extract_strided_slice %91 {offsets = [0, 64], sizes = [2, 32], strides = [1, 1]} : vector<2x96xf32> to vector<2x32xf32>
    %111 = vector.extract_strided_slice %93 {offsets = [0, 64], sizes = [2, 32], strides = [1, 1]} : vector<2x96xf32> to vector<2x32xf32>
    %112 = arith.mulf %101, %111 : vector<2x32xf32>
    %113 = arith.addf %110, %112 : vector<2x32xf32>
    %114 = math.tanh %113 : vector<2x32xf32>
    %cst_21 = arith.constant 1.000000e+00 : f32
    %115 = vector.broadcast %cst_21 : f32 to vector<2x32xf32>
    %116 = arith.subf %115, %109 : vector<2x32xf32>
    %117 = arith.mulf %116, %114 : vector<2x32xf32>
    %118 = arith.mulf %109, %90 : vector<2x32xf32>
    %119 = arith.addf %117, %118 : vector<2x32xf32>
    %120 = vector.extract_strided_slice %25 {offsets = [6, 0], sizes = [2, 96], strides = [1, 1]} : vector<16x96xf32> to vector<2x96xf32>
    %cst_22 = arith.constant dense<0.000000e+00> : vector<2x96xf32>
    %121 = tpu.matmul %119, %2, %cst_22 {dimension_numbers = #tpu.dot_dimension_numbers<[1], [0], [0], [1], [0, 0, 1, 1], [], []>} : vector<2x32xf32>, vector<32x96xf32>, vector<2x96xf32> -> vector<2x96xf32>
    %122 = arith.addf %121, %18 : vector<2x96xf32>
    %123 = vector.extract_strided_slice %120 {offsets = [0, 0], sizes = [2, 32], strides = [1, 1]} : vector<2x96xf32> to vector<2x32xf32>
    %124 = vector.extract_strided_slice %122 {offsets = [0, 0], sizes = [2, 32], strides = [1, 1]} : vector<2x96xf32> to vector<2x32xf32>
    %125 = arith.addf %123, %124 : vector<2x32xf32>
    %126 = arith.negf %125 : vector<2x32xf32>
    %127 = math.exp %126 : vector<2x32xf32>
    %cst_23 = arith.constant 1.000000e+00 : f32
    %128 = vector.broadcast %cst_23 : f32 to vector<2x32xf32>
    %129 = arith.addf %128, %127 : vector<2x32xf32>
    %130 = arith.divf %128, %129 : vector<2x32xf32>
    %131 = vector.extract_strided_slice %120 {offsets = [0, 32], sizes = [2, 32], strides = [1, 1]} : vector<2x96xf32> to vector<2x32xf32>
    %132 = vector.extract_strided_slice %122 {offsets = [0, 32], sizes = [2, 32], strides = [1, 1]} : vector<2x96xf32> to vector<2x32xf32>
    %133 = arith.addf %131, %132 : vector<2x32xf32>
    %134 = arith.negf %133 : vector<2x32xf32>
    %135 = math.exp %134 : vector<2x32xf32>
    %cst_24 = arith.constant 1.000000e+00 : f32
    %136 = vector.broadcast %cst_24 : f32 to vector<2x32xf32>
    %137 = arith.addf %136, %135 : vector<2x32xf32>
    %138 = arith.divf %136, %137 : vector<2x32xf32>
    %139 = vector.extract_strided_slice %120 {offsets = [0, 64], sizes = [2, 32], strides = [1, 1]} : vector<2x96xf32> to vector<2x32xf32>
    %140 = vector.extract_strided_slice %122 {offsets = [0, 64], sizes = [2, 32], strides = [1, 1]} : vector<2x96xf32> to vector<2x32xf32>
    %141 = arith.mulf %130, %140 : vector<2x32xf32>
    %142 = arith.addf %139, %141 : vector<2x32xf32>
    %143 = math.tanh %142 : vector<2x32xf32>
    %cst_25 = arith.constant 1.000000e+00 : f32
    %144 = vector.broadcast %cst_25 : f32 to vector<2x32xf32>
    %145 = arith.subf %144, %138 : vector<2x32xf32>
    %146 = arith.mulf %145, %143 : vector<2x32xf32>
    %147 = arith.mulf %138, %119 : vector<2x32xf32>
    %148 = arith.addf %146, %147 : vector<2x32xf32>
    %149 = vector.extract_strided_slice %25 {offsets = [8, 0], sizes = [2, 96], strides = [1, 1]} : vector<16x96xf32> to vector<2x96xf32>
    %cst_26 = arith.constant dense<0.000000e+00> : vector<2x96xf32>
    %150 = tpu.matmul %148, %2, %cst_26 {dimension_numbers = #tpu.dot_dimension_numbers<[1], [0], [0], [1], [0, 0, 1, 1], [], []>} : vector<2x32xf32>, vector<32x96xf32>, vector<2x96xf32> -> vector<2x96xf32>
    %151 = arith.addf %150, %18 : vector<2x96xf32>
    %152 = vector.extract_strided_slice %149 {offsets = [0, 0], sizes = [2, 32], strides = [1, 1]} : vector<2x96xf32> to vector<2x32xf32>
    %153 = vector.extract_strided_slice %151 {offsets = [0, 0], sizes = [2, 32], strides = [1, 1]} : vector<2x96xf32> to vector<2x32xf32>
    %154 = arith.addf %152, %153 : vector<2x32xf32>
    %155 = arith.negf %154 : vector<2x32xf32>
    %156 = math.exp %155 : vector<2x32xf32>
    %cst_27 = arith.constant 1.000000e+00 : f32
    %157 = vector.broadcast %cst_27 : f32 to vector<2x32xf32>
    %158 = arith.addf %157, %156 : vector<2x32xf32>
    %159 = arith.divf %157, %158 : vector<2x32xf32>
    %160 = vector.extract_strided_slice %149 {offsets = [0, 32], sizes = [2, 32], strides = [1, 1]} : vector<2x96xf32> to vector<2x32xf32>
    %161 = vector.extract_strided_slice %151 {offsets = [0, 32], sizes = [2, 32], strides = [1, 1]} : vector<2x96xf32> to vector<2x32xf32>
    %162 = arith.addf %160, %161 : vector<2x32xf32>
    %163 = arith.negf %162 : vector<2x32xf32>
    %164 = math.exp %163 : vector<2x32xf32>
    %cst_28 = arith.constant 1.000000e+00 : f32
    %165 = vector.broadcast %cst_28 : f32 to vector<2x32xf32>
    %166 = arith.addf %165, %164 : vector<2x32xf32>
    %167 = arith.divf %165, %166 : vector<2x32xf32>
    %168 = vector.extract_strided_slice %149 {offsets = [0, 64], sizes = [2, 32], strides = [1, 1]} : vector<2x96xf32> to vector<2x32xf32>
    %169 = vector.extract_strided_slice %151 {offsets = [0, 64], sizes = [2, 32], strides = [1, 1]} : vector<2x96xf32> to vector<2x32xf32>
    %170 = arith.mulf %159, %169 : vector<2x32xf32>
    %171 = arith.addf %168, %170 : vector<2x32xf32>
    %172 = math.tanh %171 : vector<2x32xf32>
    %cst_29 = arith.constant 1.000000e+00 : f32
    %173 = vector.broadcast %cst_29 : f32 to vector<2x32xf32>
    %174 = arith.subf %173, %167 : vector<2x32xf32>
    %175 = arith.mulf %174, %172 : vector<2x32xf32>
    %176 = arith.mulf %167, %148 : vector<2x32xf32>
    %177 = arith.addf %175, %176 : vector<2x32xf32>
    %178 = vector.extract_strided_slice %25 {offsets = [10, 0], sizes = [2, 96], strides = [1, 1]} : vector<16x96xf32> to vector<2x96xf32>
    %cst_30 = arith.constant dense<0.000000e+00> : vector<2x96xf32>
    %179 = tpu.matmul %177, %2, %cst_30 {dimension_numbers = #tpu.dot_dimension_numbers<[1], [0], [0], [1], [0, 0, 1, 1], [], []>} : vector<2x32xf32>, vector<32x96xf32>, vector<2x96xf32> -> vector<2x96xf32>
    %180 = arith.addf %179, %18 : vector<2x96xf32>
    %181 = vector.extract_strided_slice %178 {offsets = [0, 0], sizes = [2, 32], strides = [1, 1]} : vector<2x96xf32> to vector<2x32xf32>
    %182 = vector.extract_strided_slice %180 {offsets = [0, 0], sizes = [2, 32], strides = [1, 1]} : vector<2x96xf32> to vector<2x32xf32>
    %183 = arith.addf %181, %182 : vector<2x32xf32>
    %184 = arith.negf %183 : vector<2x32xf32>
    %185 = math.exp %184 : vector<2x32xf32>
    %cst_31 = arith.constant 1.000000e+00 : f32
    %186 = vector.broadcast %cst_31 : f32 to vector<2x32xf32>
    %187 = arith.addf %186, %185 : vector<2x32xf32>
    %188 = arith.divf %186, %187 : vector<2x32xf32>
    %189 = vector.extract_strided_slice %178 {offsets = [0, 32], sizes = [2, 32], strides = [1, 1]} : vector<2x96xf32> to vector<2x32xf32>
    %190 = vector.extract_strided_slice %180 {offsets = [0, 32], sizes = [2, 32], strides = [1, 1]} : vector<2x96xf32> to vector<2x32xf32>
    %191 = arith.addf %189, %190 : vector<2x32xf32>
    %192 = arith.negf %191 : vector<2x32xf32>
    %193 = math.exp %192 : vector<2x32xf32>
    %cst_32 = arith.constant 1.000000e+00 : f32
    %194 = vector.broadcast %cst_32 : f32 to vector<2x32xf32>
    %195 = arith.addf %194, %193 : vector<2x32xf32>
    %196 = arith.divf %194, %195 : vector<2x32xf32>
    %197 = vector.extract_strided_slice %178 {offsets = [0, 64], sizes = [2, 32], strides = [1, 1]} : vector<2x96xf32> to vector<2x32xf32>
    %198 = vector.extract_strided_slice %180 {offsets = [0, 64], sizes = [2, 32], strides = [1, 1]} : vector<2x96xf32> to vector<2x32xf32>
    %199 = arith.mulf %188, %198 : vector<2x32xf32>
    %200 = arith.addf %197, %199 : vector<2x32xf32>
    %201 = math.tanh %200 : vector<2x32xf32>
    %cst_33 = arith.constant 1.000000e+00 : f32
    %202 = vector.broadcast %cst_33 : f32 to vector<2x32xf32>
    %203 = arith.subf %202, %196 : vector<2x32xf32>
    %204 = arith.mulf %203, %201 : vector<2x32xf32>
    %205 = arith.mulf %196, %177 : vector<2x32xf32>
    %206 = arith.addf %204, %205 : vector<2x32xf32>
    %207 = vector.extract_strided_slice %25 {offsets = [12, 0], sizes = [2, 96], strides = [1, 1]} : vector<16x96xf32> to vector<2x96xf32>
    %cst_34 = arith.constant dense<0.000000e+00> : vector<2x96xf32>
    %208 = tpu.matmul %206, %2, %cst_34 {dimension_numbers = #tpu.dot_dimension_numbers<[1], [0], [0], [1], [0, 0, 1, 1], [], []>} : vector<2x32xf32>, vector<32x96xf32>, vector<2x96xf32> -> vector<2x96xf32>
    %209 = arith.addf %208, %18 : vector<2x96xf32>
    %210 = vector.extract_strided_slice %207 {offsets = [0, 0], sizes = [2, 32], strides = [1, 1]} : vector<2x96xf32> to vector<2x32xf32>
    %211 = vector.extract_strided_slice %209 {offsets = [0, 0], sizes = [2, 32], strides = [1, 1]} : vector<2x96xf32> to vector<2x32xf32>
    %212 = arith.addf %210, %211 : vector<2x32xf32>
    %213 = arith.negf %212 : vector<2x32xf32>
    %214 = math.exp %213 : vector<2x32xf32>
    %cst_35 = arith.constant 1.000000e+00 : f32
    %215 = vector.broadcast %cst_35 : f32 to vector<2x32xf32>
    %216 = arith.addf %215, %214 : vector<2x32xf32>
    %217 = arith.divf %215, %216 : vector<2x32xf32>
    %218 = vector.extract_strided_slice %207 {offsets = [0, 32], sizes = [2, 32], strides = [1, 1]} : vector<2x96xf32> to vector<2x32xf32>
    %219 = vector.extract_strided_slice %209 {offsets = [0, 32], sizes = [2, 32], strides = [1, 1]} : vector<2x96xf32> to vector<2x32xf32>
    %220 = arith.addf %218, %219 : vector<2x32xf32>
    %221 = arith.negf %220 : vector<2x32xf32>
    %222 = math.exp %221 : vector<2x32xf32>
    %cst_36 = arith.constant 1.000000e+00 : f32
    %223 = vector.broadcast %cst_36 : f32 to vector<2x32xf32>
    %224 = arith.addf %223, %222 : vector<2x32xf32>
    %225 = arith.divf %223, %224 : vector<2x32xf32>
    %226 = vector.extract_strided_slice %207 {offsets = [0, 64], sizes = [2, 32], strides = [1, 1]} : vector<2x96xf32> to vector<2x32xf32>
    %227 = vector.extract_strided_slice %209 {offsets = [0, 64], sizes = [2, 32], strides = [1, 1]} : vector<2x96xf32> to vector<2x32xf32>
    %228 = arith.mulf %217, %227 : vector<2x32xf32>
    %229 = arith.addf %226, %228 : vector<2x32xf32>
    %230 = math.tanh %229 : vector<2x32xf32>
    %cst_37 = arith.constant 1.000000e+00 : f32
    %231 = vector.broadcast %cst_37 : f32 to vector<2x32xf32>
    %232 = arith.subf %231, %225 : vector<2x32xf32>
    %233 = arith.mulf %232, %230 : vector<2x32xf32>
    %234 = arith.mulf %225, %206 : vector<2x32xf32>
    %235 = arith.addf %233, %234 : vector<2x32xf32>
    %236 = vector.extract_strided_slice %25 {offsets = [14, 0], sizes = [2, 96], strides = [1, 1]} : vector<16x96xf32> to vector<2x96xf32>
    %cst_38 = arith.constant dense<0.000000e+00> : vector<2x96xf32>
    %237 = tpu.matmul %235, %2, %cst_38 {dimension_numbers = #tpu.dot_dimension_numbers<[1], [0], [0], [1], [0, 0, 1, 1], [], []>} : vector<2x32xf32>, vector<32x96xf32>, vector<2x96xf32> -> vector<2x96xf32>
    %238 = arith.addf %237, %18 : vector<2x96xf32>
    %239 = vector.extract_strided_slice %236 {offsets = [0, 0], sizes = [2, 32], strides = [1, 1]} : vector<2x96xf32> to vector<2x32xf32>
    %240 = vector.extract_strided_slice %238 {offsets = [0, 0], sizes = [2, 32], strides = [1, 1]} : vector<2x96xf32> to vector<2x32xf32>
    %241 = arith.addf %239, %240 : vector<2x32xf32>
    %242 = arith.negf %241 : vector<2x32xf32>
    %243 = math.exp %242 : vector<2x32xf32>
    %cst_39 = arith.constant 1.000000e+00 : f32
    %244 = vector.broadcast %cst_39 : f32 to vector<2x32xf32>
    %245 = arith.addf %244, %243 : vector<2x32xf32>
    %246 = arith.divf %244, %245 : vector<2x32xf32>
    %247 = vector.extract_strided_slice %236 {offsets = [0, 32], sizes = [2, 32], strides = [1, 1]} : vector<2x96xf32> to vector<2x32xf32>
    %248 = vector.extract_strided_slice %238 {offsets = [0, 32], sizes = [2, 32], strides = [1, 1]} : vector<2x96xf32> to vector<2x32xf32>
    %249 = arith.addf %247, %248 : vector<2x32xf32>
    %250 = arith.negf %249 : vector<2x32xf32>
    %251 = math.exp %250 : vector<2x32xf32>
    %cst_40 = arith.constant 1.000000e+00 : f32
    %252 = vector.broadcast %cst_40 : f32 to vector<2x32xf32>
    %253 = arith.addf %252, %251 : vector<2x32xf32>
    %254 = arith.divf %252, %253 : vector<2x32xf32>
    %255 = vector.extract_strided_slice %236 {offsets = [0, 64], sizes = [2, 32], strides = [1, 1]} : vector<2x96xf32> to vector<2x32xf32>
    %256 = vector.extract_strided_slice %238 {offsets = [0, 64], sizes = [2, 32], strides = [1, 1]} : vector<2x96xf32> to vector<2x32xf32>
    %257 = arith.mulf %246, %256 : vector<2x32xf32>
    %258 = arith.addf %255, %257 : vector<2x32xf32>
    %259 = math.tanh %258 : vector<2x32xf32>
    %cst_41 = arith.constant 1.000000e+00 : f32
    %260 = vector.broadcast %cst_41 : f32 to vector<2x32xf32>
    %261 = arith.subf %260, %254 : vector<2x32xf32>
    %262 = arith.mulf %261, %259 : vector<2x32xf32>
    %263 = arith.mulf %254, %235 : vector<2x32xf32>
    %264 = arith.addf %262, %263 : vector<2x32xf32>
    %265 = vector.extract_strided_slice %28 {offsets = [0, 0], sizes = [2, 96], strides = [1, 1]} : vector<16x96xf32> to vector<2x96xf32>
    %c0_42 = arith.constant 0 : index
    %c0_43 = arith.constant 0 : index
    %266 = vector.load %arg6[%c0_42, %c0_43] : memref<2x96xf32, #tpu.memory_space<vmem>>, vector<2x96xf32>
    tpu.vector_store %arg6[%c0_42, %c0_43], %265 {strides = array<i32>} : memref<2x96xf32, #tpu.memory_space<vmem>>, vector<2x96xf32>,
    %c0_44 = arith.constant 0 : index
    %c0_45 = arith.constant 0 : index
    %267 = vector.load %arg6[%c0_44, %c0_45] : memref<2x96xf32, #tpu.memory_space<vmem>>, vector<2x96xf32>
    %cst_46 = arith.constant dense<0.000000e+00> : vector<2x96xf32>
    %268 = tpu.matmul %264, %4, %cst_46 {dimension_numbers = #tpu.dot_dimension_numbers<[1], [0], [0], [1], [0, 0, 1, 1], [], []>} : vector<2x32xf32>, vector<32x96xf32>, vector<2x96xf32> -> vector<2x96xf32>
    %269 = arith.addf %268, %20 : vector<2x96xf32>
    %270 = vector.extract_strided_slice %267 {offsets = [0, 0], sizes = [2, 32], strides = [1, 1]} : vector<2x96xf32> to vector<2x32xf32>
    %271 = vector.extract_strided_slice %269 {offsets = [0, 0], sizes = [2, 32], strides = [1, 1]} : vector<2x96xf32> to vector<2x32xf32>
    %272 = arith.addf %270, %271 : vector<2x32xf32>
    %273 = arith.negf %272 : vector<2x32xf32>
    %274 = math.exp %273 : vector<2x32xf32>
    %cst_47 = arith.constant 1.000000e+00 : f32
    %275 = vector.broadcast %cst_47 : f32 to vector<2x32xf32>
    %276 = arith.addf %275, %274 : vector<2x32xf32>
    %277 = arith.divf %275, %276 : vector<2x32xf32>
    %278 = vector.extract_strided_slice %267 {offsets = [0, 32], sizes = [2, 32], strides = [1, 1]} : vector<2x96xf32> to vector<2x32xf32>
    %279 = vector.extract_strided_slice %269 {offsets = [0, 32], sizes = [2, 32], strides = [1, 1]} : vector<2x96xf32> to vector<2x32xf32>
    %280 = arith.addf %278, %279 : vector<2x32xf32>
    %281 = arith.negf %280 : vector<2x32xf32>
    %282 = math.exp %281 : vector<2x32xf32>
    %cst_48 = arith.constant 1.000000e+00 : f32
    %283 = vector.broadcast %cst_48 : f32 to vector<2x32xf32>
    %284 = arith.addf %283, %282 : vector<2x32xf32>
    %285 = arith.divf %283, %284 : vector<2x32xf32>
    %286 = vector.extract_strided_slice %267 {offsets = [0, 64], sizes = [2, 32], strides = [1, 1]} : vector<2x96xf32> to vector<2x32xf32>
    %287 = vector.extract_strided_slice %269 {offsets = [0, 64], sizes = [2, 32], strides = [1, 1]} : vector<2x96xf32> to vector<2x32xf32>
    %288 = arith.mulf %277, %287 : vector<2x32xf32>
    %289 = arith.addf %286, %288 : vector<2x32xf32>
    %290 = math.tanh %289 : vector<2x32xf32>
    %cst_49 = arith.constant 1.000000e+00 : f32
    %291 = vector.broadcast %cst_49 : f32 to vector<2x32xf32>
    %292 = arith.subf %291, %285 : vector<2x32xf32>
    %293 = arith.mulf %292, %290 : vector<2x32xf32>
    %294 = arith.mulf %285, %264 : vector<2x32xf32>
    %295 = arith.addf %293, %294 : vector<2x32xf32>
    %296 = vector.extract_strided_slice %28 {offsets = [2, 0], sizes = [2, 96], strides = [1, 1]} : vector<16x96xf32> to vector<2x96xf32>
    %c0_50 = arith.constant 0 : index
    %c0_51 = arith.constant 0 : index
    %297 = vector.load %arg6[%c0_50, %c0_51] : memref<2x96xf32, #tpu.memory_space<vmem>>, vector<2x96xf32>
    tpu.vector_store %arg6[%c0_50, %c0_51], %296 {strides = array<i32>} : memref<2x96xf32, #tpu.memory_space<vmem>>, vector<2x96xf32>,
    %c1 = arith.constant 1 : index
    %298 = memref.load %arg0[%c1] : memref<8xi32, #tpu.memory_space<smem>>
    %c0_i32 = arith.constant 0 : i32
    %299 = arith.cmpi eq, %298, %c0_i32 : i32
    %300 = arith.extui %299 : i1 to i32
    %c0_i32_52 = arith.constant 0 : i32
    %301 = arith.cmpi ne, %300, %c0_i32_52 : i32
    scf.if %301 {
      %cst_119 = arith.constant dense<0.000000e+00> : vector<2x16xf32>
      %523 = tpu.matmul %295, %11, %cst_119 {dimension_numbers = #tpu.dot_dimension_numbers<[1], [0], [0], [1], [0, 0, 1, 1], [], []>} : vector<2x32xf32>, vector<32x16xf32>, vector<2x16xf32> -> vector<2x16xf32>
      %524 = arith.addf %523, %22 : vector<2x16xf32>
      %525 = tpu.iota {dimensions = array<i32: 1>} : vector<2x16xi32>
      %cst_120 = arith.constant dense<0xFF800000> : vector<2xf32>
      %526 = vector.multi_reduction <maximumf>, %524, %cst_120 [1] : vector<2x16xf32> to vector<2xf32>
      %527 = vector.shape_cast %526 : vector<2xf32> to vector<2x1xf32>
      %528 = vector.broadcast %527 : vector<2x1xf32> to vector<2x16xf32>
      %529 = arith.cmpf oeq, %524, %528 : vector<2x16xf32>
      %c16_i32 = arith.constant 16 : i32
      %530 = vector.broadcast %c16_i32 : i32 to vector<2x16xi32>
      %531 = arith.select %529, %525, %530 : vector<2x16xi1>, vector<2x16xi32>
      %cst_121 = arith.constant dense<2147483647> : vector<2xi32>
      %532 = vector.multi_reduction <minsi>, %531, %cst_121 [1] : vector<2x16xi32> to vector<2xi32>
      %533 = vector.shape_cast %532 : vector<2xi32> to vector<2x1xi32>
      %534 = vector.broadcast %533 : vector<2x1xi32> to vector<2x16xi32>
      %535 = arith.cmpi eq, %525, %534 : vector<2x16xi32>
      %536 = arith.extui %535 : vector<2x16xi1> to vector<2x16xi32>
      %537 = arith.sitofp %536 : vector<2x16xi32> to vector<2x16xf32>
      %cst_122 = arith.constant dense<0.000000e+00> : vector<2x96xf32>
      %538 = tpu.matmul %537, %31, %cst_122 {dimension_numbers = #tpu.dot_dimension_numbers<[1], [0], [0], [1], [0, 0, 1, 1], [], []>} : vector<2x16xf32>, vector<16x96xf32>, vector<2x96xf32> -> vector<2x96xf32>
      %c0_123 = arith.constant 0 : index
      %c0_124 = arith.constant 0 : index
      %539 = vector.load %arg6[%c0_123, %c0_124] : memref<2x96xf32, #tpu.memory_space<vmem>>, vector<2x96xf32>
      tpu.vector_store %arg6[%c0_123, %c0_124], %538 {strides = array<i32>} : memref<2x96xf32, #tpu.memory_space<vmem>>, vector<2x96xf32>,
    } else {
    }
    %c0_53 = arith.constant 0 : index
    %c0_54 = arith.constant 0 : index
    %302 = vector.load %arg6[%c0_53, %c0_54] : memref<2x96xf32, #tpu.memory_space<vmem>>, vector<2x96xf32>
    %cst_55 = arith.constant dense<0.000000e+00> : vector<2x96xf32>
    %303 = tpu.matmul %295, %4, %cst_55 {dimension_numbers = #tpu.dot_dimension_numbers<[1], [0], [0], [1], [0, 0, 1, 1], [], []>} : vector<2x32xf32>, vector<32x96xf32>, vector<2x96xf32> -> vector<2x96xf32>
    %304 = arith.addf %303, %20 : vector<2x96xf32>
    %305 = vector.extract_strided_slice %302 {offsets = [0, 0], sizes = [2, 32], strides = [1, 1]} : vector<2x96xf32> to vector<2x32xf32>
    %306 = vector.extract_strided_slice %304 {offsets = [0, 0], sizes = [2, 32], strides = [1, 1]} : vector<2x96xf32> to vector<2x32xf32>
    %307 = arith.addf %305, %306 : vector<2x32xf32>
    %308 = arith.negf %307 : vector<2x32xf32>
    %309 = math.exp %308 : vector<2x32xf32>
    %cst_56 = arith.constant 1.000000e+00 : f32
    %310 = vector.broadcast %cst_56 : f32 to vector<2x32xf32>
    %311 = arith.addf %310, %309 : vector<2x32xf32>
    %312 = arith.divf %310, %311 : vector<2x32xf32>
    %313 = vector.extract_strided_slice %302 {offsets = [0, 32], sizes = [2, 32], strides = [1, 1]} : vector<2x96xf32> to vector<2x32xf32>
    %314 = vector.extract_strided_slice %304 {offsets = [0, 32], sizes = [2, 32], strides = [1, 1]} : vector<2x96xf32> to vector<2x32xf32>
    %315 = arith.addf %313, %314 : vector<2x32xf32>
    %316 = arith.negf %315 : vector<2x32xf32>
    %317 = math.exp %316 : vector<2x32xf32>
    %cst_57 = arith.constant 1.000000e+00 : f32
    %318 = vector.broadcast %cst_57 : f32 to vector<2x32xf32>
    %319 = arith.addf %318, %317 : vector<2x32xf32>
    %320 = arith.divf %318, %319 : vector<2x32xf32>
    %321 = vector.extract_strided_slice %302 {offsets = [0, 64], sizes = [2, 32], strides = [1, 1]} : vector<2x96xf32> to vector<2x32xf32>
    %322 = vector.extract_strided_slice %304 {offsets = [0, 64], sizes = [2, 32], strides = [1, 1]} : vector<2x96xf32> to vector<2x32xf32>
    %323 = arith.mulf %312, %322 : vector<2x32xf32>
    %324 = arith.addf %321, %323 : vector<2x32xf32>
    %325 = math.tanh %324 : vector<2x32xf32>
    %cst_58 = arith.constant 1.000000e+00 : f32
    %326 = vector.broadcast %cst_58 : f32 to vector<2x32xf32>
    %327 = arith.subf %326, %320 : vector<2x32xf32>
    %328 = arith.mulf %327, %325 : vector<2x32xf32>
    %329 = arith.mulf %320, %295 : vector<2x32xf32>
    %330 = arith.addf %328, %329 : vector<2x32xf32>
    %331 = vector.extract_strided_slice %28 {offsets = [4, 0], sizes = [2, 96], strides = [1, 1]} : vector<16x96xf32> to vector<2x96xf32>
    %c0_59 = arith.constant 0 : index
    %c0_60 = arith.constant 0 : index
    %332 = vector.load %arg6[%c0_59, %c0_60] : memref<2x96xf32, #tpu.memory_space<vmem>>, vector<2x96xf32>
    tpu.vector_store %arg6[%c0_59, %c0_60], %331 {strides = array<i32>} : memref<2x96xf32, #tpu.memory_space<vmem>>, vector<2x96xf32>,
    %c2 = arith.constant 2 : index
    %333 = memref.load %arg0[%c2] : memref<8xi32, #tpu.memory_space<smem>>
    %c0_i32_61 = arith.constant 0 : i32
    %334 = arith.cmpi eq, %333, %c0_i32_61 : i32
    %335 = arith.extui %334 : i1 to i32
    %c0_i32_62 = arith.constant 0 : i32
    %336 = arith.cmpi ne, %335, %c0_i32_62 : i32
    scf.if %336 {
      %cst_119 = arith.constant dense<0.000000e+00> : vector<2x16xf32>
      %523 = tpu.matmul %330, %11, %cst_119 {dimension_numbers = #tpu.dot_dimension_numbers<[1], [0], [0], [1], [0, 0, 1, 1], [], []>} : vector<2x32xf32>, vector<32x16xf32>, vector<2x16xf32> -> vector<2x16xf32>
      %524 = arith.addf %523, %22 : vector<2x16xf32>
      %525 = tpu.iota {dimensions = array<i32: 1>} : vector<2x16xi32>
      %cst_120 = arith.constant dense<0xFF800000> : vector<2xf32>
      %526 = vector.multi_reduction <maximumf>, %524, %cst_120 [1] : vector<2x16xf32> to vector<2xf32>
      %527 = vector.shape_cast %526 : vector<2xf32> to vector<2x1xf32>
      %528 = vector.broadcast %527 : vector<2x1xf32> to vector<2x16xf32>
      %529 = arith.cmpf oeq, %524, %528 : vector<2x16xf32>
      %c16_i32 = arith.constant 16 : i32
      %530 = vector.broadcast %c16_i32 : i32 to vector<2x16xi32>
      %531 = arith.select %529, %525, %530 : vector<2x16xi1>, vector<2x16xi32>
      %cst_121 = arith.constant dense<2147483647> : vector<2xi32>
      %532 = vector.multi_reduction <minsi>, %531, %cst_121 [1] : vector<2x16xi32> to vector<2xi32>
      %533 = vector.shape_cast %532 : vector<2xi32> to vector<2x1xi32>
      %534 = vector.broadcast %533 : vector<2x1xi32> to vector<2x16xi32>
      %535 = arith.cmpi eq, %525, %534 : vector<2x16xi32>
      %536 = arith.extui %535 : vector<2x16xi1> to vector<2x16xi32>
      %537 = arith.sitofp %536 : vector<2x16xi32> to vector<2x16xf32>
      %cst_122 = arith.constant dense<0.000000e+00> : vector<2x96xf32>
      %538 = tpu.matmul %537, %31, %cst_122 {dimension_numbers = #tpu.dot_dimension_numbers<[1], [0], [0], [1], [0, 0, 1, 1], [], []>} : vector<2x16xf32>, vector<16x96xf32>, vector<2x96xf32> -> vector<2x96xf32>
      %c0_123 = arith.constant 0 : index
      %c0_124 = arith.constant 0 : index
      %539 = vector.load %arg6[%c0_123, %c0_124] : memref<2x96xf32, #tpu.memory_space<vmem>>, vector<2x96xf32>
      tpu.vector_store %arg6[%c0_123, %c0_124], %538 {strides = array<i32>} : memref<2x96xf32, #tpu.memory_space<vmem>>, vector<2x96xf32>,
    } else {
    }
    %c0_63 = arith.constant 0 : index
    %c0_64 = arith.constant 0 : index
    %337 = vector.load %arg6[%c0_63, %c0_64] : memref<2x96xf32, #tpu.memory_space<vmem>>, vector<2x96xf32>
    %cst_65 = arith.constant dense<0.000000e+00> : vector<2x96xf32>
    %338 = tpu.matmul %330, %4, %cst_65 {dimension_numbers = #tpu.dot_dimension_numbers<[1], [0], [0], [1], [0, 0, 1, 1], [], []>} : vector<2x32xf32>, vector<32x96xf32>, vector<2x96xf32> -> vector<2x96xf32>
    %339 = arith.addf %338, %20 : vector<2x96xf32>
    %340 = vector.extract_strided_slice %337 {offsets = [0, 0], sizes = [2, 32], strides = [1, 1]} : vector<2x96xf32> to vector<2x32xf32>
    %341 = vector.extract_strided_slice %339 {offsets = [0, 0], sizes = [2, 32], strides = [1, 1]} : vector<2x96xf32> to vector<2x32xf32>
    %342 = arith.addf %340, %341 : vector<2x32xf32>
    %343 = arith.negf %342 : vector<2x32xf32>
    %344 = math.exp %343 : vector<2x32xf32>
    %cst_66 = arith.constant 1.000000e+00 : f32
    %345 = vector.broadcast %cst_66 : f32 to vector<2x32xf32>
    %346 = arith.addf %345, %344 : vector<2x32xf32>
    %347 = arith.divf %345, %346 : vector<2x32xf32>
    %348 = vector.extract_strided_slice %337 {offsets = [0, 32], sizes = [2, 32], strides = [1, 1]} : vector<2x96xf32> to vector<2x32xf32>
    %349 = vector.extract_strided_slice %339 {offsets = [0, 32], sizes = [2, 32], strides = [1, 1]} : vector<2x96xf32> to vector<2x32xf32>
    %350 = arith.addf %348, %349 : vector<2x32xf32>
    %351 = arith.negf %350 : vector<2x32xf32>
    %352 = math.exp %351 : vector<2x32xf32>
    %cst_67 = arith.constant 1.000000e+00 : f32
    %353 = vector.broadcast %cst_67 : f32 to vector<2x32xf32>
    %354 = arith.addf %353, %352 : vector<2x32xf32>
    %355 = arith.divf %353, %354 : vector<2x32xf32>
    %356 = vector.extract_strided_slice %337 {offsets = [0, 64], sizes = [2, 32], strides = [1, 1]} : vector<2x96xf32> to vector<2x32xf32>
    %357 = vector.extract_strided_slice %339 {offsets = [0, 64], sizes = [2, 32], strides = [1, 1]} : vector<2x96xf32> to vector<2x32xf32>
    %358 = arith.mulf %347, %357 : vector<2x32xf32>
    %359 = arith.addf %356, %358 : vector<2x32xf32>
    %360 = math.tanh %359 : vector<2x32xf32>
    %cst_68 = arith.constant 1.000000e+00 : f32
    %361 = vector.broadcast %cst_68 : f32 to vector<2x32xf32>
    %362 = arith.subf %361, %355 : vector<2x32xf32>
    %363 = arith.mulf %362, %360 : vector<2x32xf32>
    %364 = arith.mulf %355, %330 : vector<2x32xf32>
    %365 = arith.addf %363, %364 : vector<2x32xf32>
    %366 = vector.extract_strided_slice %28 {offsets = [6, 0], sizes = [2, 96], strides = [1, 1]} : vector<16x96xf32> to vector<2x96xf32>
    %c0_69 = arith.constant 0 : index
    %c0_70 = arith.constant 0 : index
    %367 = vector.load %arg6[%c0_69, %c0_70] : memref<2x96xf32, #tpu.memory_space<vmem>>, vector<2x96xf32>
    tpu.vector_store %arg6[%c0_69, %c0_70], %366 {strides = array<i32>} : memref<2x96xf32, #tpu.memory_space<vmem>>, vector<2x96xf32>,
    %c3 = arith.constant 3 : index
    %368 = memref.load %arg0[%c3] : memref<8xi32, #tpu.memory_space<smem>>
    %c0_i32_71 = arith.constant 0 : i32
    %369 = arith.cmpi eq, %368, %c0_i32_71 : i32
    %370 = arith.extui %369 : i1 to i32
    %c0_i32_72 = arith.constant 0 : i32
    %371 = arith.cmpi ne, %370, %c0_i32_72 : i32
    scf.if %371 {
      %cst_119 = arith.constant dense<0.000000e+00> : vector<2x16xf32>
      %523 = tpu.matmul %365, %11, %cst_119 {dimension_numbers = #tpu.dot_dimension_numbers<[1], [0], [0], [1], [0, 0, 1, 1], [], []>} : vector<2x32xf32>, vector<32x16xf32>, vector<2x16xf32> -> vector<2x16xf32>
      %524 = arith.addf %523, %22 : vector<2x16xf32>
      %525 = tpu.iota {dimensions = array<i32: 1>} : vector<2x16xi32>
      %cst_120 = arith.constant dense<0xFF800000> : vector<2xf32>
      %526 = vector.multi_reduction <maximumf>, %524, %cst_120 [1] : vector<2x16xf32> to vector<2xf32>
      %527 = vector.shape_cast %526 : vector<2xf32> to vector<2x1xf32>
      %528 = vector.broadcast %527 : vector<2x1xf32> to vector<2x16xf32>
      %529 = arith.cmpf oeq, %524, %528 : vector<2x16xf32>
      %c16_i32 = arith.constant 16 : i32
      %530 = vector.broadcast %c16_i32 : i32 to vector<2x16xi32>
      %531 = arith.select %529, %525, %530 : vector<2x16xi1>, vector<2x16xi32>
      %cst_121 = arith.constant dense<2147483647> : vector<2xi32>
      %532 = vector.multi_reduction <minsi>, %531, %cst_121 [1] : vector<2x16xi32> to vector<2xi32>
      %533 = vector.shape_cast %532 : vector<2xi32> to vector<2x1xi32>
      %534 = vector.broadcast %533 : vector<2x1xi32> to vector<2x16xi32>
      %535 = arith.cmpi eq, %525, %534 : vector<2x16xi32>
      %536 = arith.extui %535 : vector<2x16xi1> to vector<2x16xi32>
      %537 = arith.sitofp %536 : vector<2x16xi32> to vector<2x16xf32>
      %cst_122 = arith.constant dense<0.000000e+00> : vector<2x96xf32>
      %538 = tpu.matmul %537, %31, %cst_122 {dimension_numbers = #tpu.dot_dimension_numbers<[1], [0], [0], [1], [0, 0, 1, 1], [], []>} : vector<2x16xf32>, vector<16x96xf32>, vector<2x96xf32> -> vector<2x96xf32>
      %c0_123 = arith.constant 0 : index
      %c0_124 = arith.constant 0 : index
      %539 = vector.load %arg6[%c0_123, %c0_124] : memref<2x96xf32, #tpu.memory_space<vmem>>, vector<2x96xf32>
      tpu.vector_store %arg6[%c0_123, %c0_124], %538 {strides = array<i32>} : memref<2x96xf32, #tpu.memory_space<vmem>>, vector<2x96xf32>,
    } else {
    }
    %c0_73 = arith.constant 0 : index
    %c0_74 = arith.constant 0 : index
    %372 = vector.load %arg6[%c0_73, %c0_74] : memref<2x96xf32, #tpu.memory_space<vmem>>, vector<2x96xf32>
    %cst_75 = arith.constant dense<0.000000e+00> : vector<2x96xf32>
    %373 = tpu.matmul %365, %4, %cst_75 {dimension_numbers = #tpu.dot_dimension_numbers<[1], [0], [0], [1], [0, 0, 1, 1], [], []>} : vector<2x32xf32>, vector<32x96xf32>, vector<2x96xf32> -> vector<2x96xf32>
    %374 = arith.addf %373, %20 : vector<2x96xf32>
    %375 = vector.extract_strided_slice %372 {offsets = [0, 0], sizes = [2, 32], strides = [1, 1]} : vector<2x96xf32> to vector<2x32xf32>
    %376 = vector.extract_strided_slice %374 {offsets = [0, 0], sizes = [2, 32], strides = [1, 1]} : vector<2x96xf32> to vector<2x32xf32>
    %377 = arith.addf %375, %376 : vector<2x32xf32>
    %378 = arith.negf %377 : vector<2x32xf32>
    %379 = math.exp %378 : vector<2x32xf32>
    %cst_76 = arith.constant 1.000000e+00 : f32
    %380 = vector.broadcast %cst_76 : f32 to vector<2x32xf32>
    %381 = arith.addf %380, %379 : vector<2x32xf32>
    %382 = arith.divf %380, %381 : vector<2x32xf32>
    %383 = vector.extract_strided_slice %372 {offsets = [0, 32], sizes = [2, 32], strides = [1, 1]} : vector<2x96xf32> to vector<2x32xf32>
    %384 = vector.extract_strided_slice %374 {offsets = [0, 32], sizes = [2, 32], strides = [1, 1]} : vector<2x96xf32> to vector<2x32xf32>
    %385 = arith.addf %383, %384 : vector<2x32xf32>
    %386 = arith.negf %385 : vector<2x32xf32>
    %387 = math.exp %386 : vector<2x32xf32>
    %cst_77 = arith.constant 1.000000e+00 : f32
    %388 = vector.broadcast %cst_77 : f32 to vector<2x32xf32>
    %389 = arith.addf %388, %387 : vector<2x32xf32>
    %390 = arith.divf %388, %389 : vector<2x32xf32>
    %391 = vector.extract_strided_slice %372 {offsets = [0, 64], sizes = [2, 32], strides = [1, 1]} : vector<2x96xf32> to vector<2x32xf32>
    %392 = vector.extract_strided_slice %374 {offsets = [0, 64], sizes = [2, 32], strides = [1, 1]} : vector<2x96xf32> to vector<2x32xf32>
    %393 = arith.mulf %382, %392 : vector<2x32xf32>
    %394 = arith.addf %391, %393 : vector<2x32xf32>
    %395 = math.tanh %394 : vector<2x32xf32>
    %cst_78 = arith.constant 1.000000e+00 : f32
    %396 = vector.broadcast %cst_78 : f32 to vector<2x32xf32>
    %397 = arith.subf %396, %390 : vector<2x32xf32>
    %398 = arith.mulf %397, %395 : vector<2x32xf32>
    %399 = arith.mulf %390, %365 : vector<2x32xf32>
    %400 = arith.addf %398, %399 : vector<2x32xf32>
    %401 = vector.extract_strided_slice %28 {offsets = [8, 0], sizes = [2, 96], strides = [1, 1]} : vector<16x96xf32> to vector<2x96xf32>
    %c0_79 = arith.constant 0 : index
    %c0_80 = arith.constant 0 : index
    %402 = vector.load %arg6[%c0_79, %c0_80] : memref<2x96xf32, #tpu.memory_space<vmem>>, vector<2x96xf32>
    tpu.vector_store %arg6[%c0_79, %c0_80], %401 {strides = array<i32>} : memref<2x96xf32, #tpu.memory_space<vmem>>, vector<2x96xf32>,
    %c4 = arith.constant 4 : index
    %403 = memref.load %arg0[%c4] : memref<8xi32, #tpu.memory_space<smem>>
    %c0_i32_81 = arith.constant 0 : i32
    %404 = arith.cmpi eq, %403, %c0_i32_81 : i32
    %405 = arith.extui %404 : i1 to i32
    %c0_i32_82 = arith.constant 0 : i32
    %406 = arith.cmpi ne, %405, %c0_i32_82 : i32
    scf.if %406 {
      %cst_119 = arith.constant dense<0.000000e+00> : vector<2x16xf32>
      %523 = tpu.matmul %400, %11, %cst_119 {dimension_numbers = #tpu.dot_dimension_numbers<[1], [0], [0], [1], [0, 0, 1, 1], [], []>} : vector<2x32xf32>, vector<32x16xf32>, vector<2x16xf32> -> vector<2x16xf32>
      %524 = arith.addf %523, %22 : vector<2x16xf32>
      %525 = tpu.iota {dimensions = array<i32: 1>} : vector<2x16xi32>
      %cst_120 = arith.constant dense<0xFF800000> : vector<2xf32>
      %526 = vector.multi_reduction <maximumf>, %524, %cst_120 [1] : vector<2x16xf32> to vector<2xf32>
      %527 = vector.shape_cast %526 : vector<2xf32> to vector<2x1xf32>
      %528 = vector.broadcast %527 : vector<2x1xf32> to vector<2x16xf32>
      %529 = arith.cmpf oeq, %524, %528 : vector<2x16xf32>
      %c16_i32 = arith.constant 16 : i32
      %530 = vector.broadcast %c16_i32 : i32 to vector<2x16xi32>
      %531 = arith.select %529, %525, %530 : vector<2x16xi1>, vector<2x16xi32>
      %cst_121 = arith.constant dense<2147483647> : vector<2xi32>
      %532 = vector.multi_reduction <minsi>, %531, %cst_121 [1] : vector<2x16xi32> to vector<2xi32>
      %533 = vector.shape_cast %532 : vector<2xi32> to vector<2x1xi32>
      %534 = vector.broadcast %533 : vector<2x1xi32> to vector<2x16xi32>
      %535 = arith.cmpi eq, %525, %534 : vector<2x16xi32>
      %536 = arith.extui %535 : vector<2x16xi1> to vector<2x16xi32>
      %537 = arith.sitofp %536 : vector<2x16xi32> to vector<2x16xf32>
      %cst_122 = arith.constant dense<0.000000e+00> : vector<2x96xf32>
      %538 = tpu.matmul %537, %31, %cst_122 {dimension_numbers = #tpu.dot_dimension_numbers<[1], [0], [0], [1], [0, 0, 1, 1], [], []>} : vector<2x16xf32>, vector<16x96xf32>, vector<2x96xf32> -> vector<2x96xf32>
      %c0_123 = arith.constant 0 : index
      %c0_124 = arith.constant 0 : index
      %539 = vector.load %arg6[%c0_123, %c0_124] : memref<2x96xf32, #tpu.memory_space<vmem>>, vector<2x96xf32>
      tpu.vector_store %arg6[%c0_123, %c0_124], %538 {strides = array<i32>} : memref<2x96xf32, #tpu.memory_space<vmem>>, vector<2x96xf32>,
    } else {
    }
    %c0_83 = arith.constant 0 : index
    %c0_84 = arith.constant 0 : index
    %407 = vector.load %arg6[%c0_83, %c0_84] : memref<2x96xf32, #tpu.memory_space<vmem>>, vector<2x96xf32>
    %cst_85 = arith.constant dense<0.000000e+00> : vector<2x96xf32>
    %408 = tpu.matmul %400, %4, %cst_85 {dimension_numbers = #tpu.dot_dimension_numbers<[1], [0], [0], [1], [0, 0, 1, 1], [], []>} : vector<2x32xf32>, vector<32x96xf32>, vector<2x96xf32> -> vector<2x96xf32>
    %409 = arith.addf %408, %20 : vector<2x96xf32>
    %410 = vector.extract_strided_slice %407 {offsets = [0, 0], sizes = [2, 32], strides = [1, 1]} : vector<2x96xf32> to vector<2x32xf32>
    %411 = vector.extract_strided_slice %409 {offsets = [0, 0], sizes = [2, 32], strides = [1, 1]} : vector<2x96xf32> to vector<2x32xf32>
    %412 = arith.addf %410, %411 : vector<2x32xf32>
    %413 = arith.negf %412 : vector<2x32xf32>
    %414 = math.exp %413 : vector<2x32xf32>
    %cst_86 = arith.constant 1.000000e+00 : f32
    %415 = vector.broadcast %cst_86 : f32 to vector<2x32xf32>
    %416 = arith.addf %415, %414 : vector<2x32xf32>
    %417 = arith.divf %415, %416 : vector<2x32xf32>
    %418 = vector.extract_strided_slice %407 {offsets = [0, 32], sizes = [2, 32], strides = [1, 1]} : vector<2x96xf32> to vector<2x32xf32>
    %419 = vector.extract_strided_slice %409 {offsets = [0, 32], sizes = [2, 32], strides = [1, 1]} : vector<2x96xf32> to vector<2x32xf32>
    %420 = arith.addf %418, %419 : vector<2x32xf32>
    %421 = arith.negf %420 : vector<2x32xf32>
    %422 = math.exp %421 : vector<2x32xf32>
    %cst_87 = arith.constant 1.000000e+00 : f32
    %423 = vector.broadcast %cst_87 : f32 to vector<2x32xf32>
    %424 = arith.addf %423, %422 : vector<2x32xf32>
    %425 = arith.divf %423, %424 : vector<2x32xf32>
    %426 = vector.extract_strided_slice %407 {offsets = [0, 64], sizes = [2, 32], strides = [1, 1]} : vector<2x96xf32> to vector<2x32xf32>
    %427 = vector.extract_strided_slice %409 {offsets = [0, 64], sizes = [2, 32], strides = [1, 1]} : vector<2x96xf32> to vector<2x32xf32>
    %428 = arith.mulf %417, %427 : vector<2x32xf32>
    %429 = arith.addf %426, %428 : vector<2x32xf32>
    %430 = math.tanh %429 : vector<2x32xf32>
    %cst_88 = arith.constant 1.000000e+00 : f32
    %431 = vector.broadcast %cst_88 : f32 to vector<2x32xf32>
    %432 = arith.subf %431, %425 : vector<2x32xf32>
    %433 = arith.mulf %432, %430 : vector<2x32xf32>
    %434 = arith.mulf %425, %400 : vector<2x32xf32>
    %435 = arith.addf %433, %434 : vector<2x32xf32>
    %436 = vector.extract_strided_slice %28 {offsets = [10, 0], sizes = [2, 96], strides = [1, 1]} : vector<16x96xf32> to vector<2x96xf32>
    %c0_89 = arith.constant 0 : index
    %c0_90 = arith.constant 0 : index
    %437 = vector.load %arg6[%c0_89, %c0_90] : memref<2x96xf32, #tpu.memory_space<vmem>>, vector<2x96xf32>
    tpu.vector_store %arg6[%c0_89, %c0_90], %436 {strides = array<i32>} : memref<2x96xf32, #tpu.memory_space<vmem>>, vector<2x96xf32>,
    %c5 = arith.constant 5 : index
    %438 = memref.load %arg0[%c5] : memref<8xi32, #tpu.memory_space<smem>>
    %c0_i32_91 = arith.constant 0 : i32
    %439 = arith.cmpi eq, %438, %c0_i32_91 : i32
    %440 = arith.extui %439 : i1 to i32
    %c0_i32_92 = arith.constant 0 : i32
    %441 = arith.cmpi ne, %440, %c0_i32_92 : i32
    scf.if %441 {
      %cst_119 = arith.constant dense<0.000000e+00> : vector<2x16xf32>
      %523 = tpu.matmul %435, %11, %cst_119 {dimension_numbers = #tpu.dot_dimension_numbers<[1], [0], [0], [1], [0, 0, 1, 1], [], []>} : vector<2x32xf32>, vector<32x16xf32>, vector<2x16xf32> -> vector<2x16xf32>
      %524 = arith.addf %523, %22 : vector<2x16xf32>
      %525 = tpu.iota {dimensions = array<i32: 1>} : vector<2x16xi32>
      %cst_120 = arith.constant dense<0xFF800000> : vector<2xf32>
      %526 = vector.multi_reduction <maximumf>, %524, %cst_120 [1] : vector<2x16xf32> to vector<2xf32>
      %527 = vector.shape_cast %526 : vector<2xf32> to vector<2x1xf32>
      %528 = vector.broadcast %527 : vector<2x1xf32> to vector<2x16xf32>
      %529 = arith.cmpf oeq, %524, %528 : vector<2x16xf32>
      %c16_i32 = arith.constant 16 : i32
      %530 = vector.broadcast %c16_i32 : i32 to vector<2x16xi32>
      %531 = arith.select %529, %525, %530 : vector<2x16xi1>, vector<2x16xi32>
      %cst_121 = arith.constant dense<2147483647> : vector<2xi32>
      %532 = vector.multi_reduction <minsi>, %531, %cst_121 [1] : vector<2x16xi32> to vector<2xi32>
      %533 = vector.shape_cast %532 : vector<2xi32> to vector<2x1xi32>
      %534 = vector.broadcast %533 : vector<2x1xi32> to vector<2x16xi32>
      %535 = arith.cmpi eq, %525, %534 : vector<2x16xi32>
      %536 = arith.extui %535 : vector<2x16xi1> to vector<2x16xi32>
      %537 = arith.sitofp %536 : vector<2x16xi32> to vector<2x16xf32>
      %cst_122 = arith.constant dense<0.000000e+00> : vector<2x96xf32>
      %538 = tpu.matmul %537, %31, %cst_122 {dimension_numbers = #tpu.dot_dimension_numbers<[1], [0], [0], [1], [0, 0, 1, 1], [], []>} : vector<2x16xf32>, vector<16x96xf32>, vector<2x96xf32> -> vector<2x96xf32>
      %c0_123 = arith.constant 0 : index
      %c0_124 = arith.constant 0 : index
      %539 = vector.load %arg6[%c0_123, %c0_124] : memref<2x96xf32, #tpu.memory_space<vmem>>, vector<2x96xf32>
      tpu.vector_store %arg6[%c0_123, %c0_124], %538 {strides = array<i32>} : memref<2x96xf32, #tpu.memory_space<vmem>>, vector<2x96xf32>,
    } else {
    }
    %c0_93 = arith.constant 0 : index
    %c0_94 = arith.constant 0 : index
    %442 = vector.load %arg6[%c0_93, %c0_94] : memref<2x96xf32, #tpu.memory_space<vmem>>, vector<2x96xf32>
    %cst_95 = arith.constant dense<0.000000e+00> : vector<2x96xf32>
    %443 = tpu.matmul %435, %4, %cst_95 {dimension_numbers = #tpu.dot_dimension_numbers<[1], [0], [0], [1], [0, 0, 1, 1], [], []>} : vector<2x32xf32>, vector<32x96xf32>, vector<2x96xf32> -> vector<2x96xf32>
    %444 = arith.addf %443, %20 : vector<2x96xf32>
    %445 = vector.extract_strided_slice %442 {offsets = [0, 0], sizes = [2, 32], strides = [1, 1]} : vector<2x96xf32> to vector<2x32xf32>
    %446 = vector.extract_strided_slice %444 {offsets = [0, 0], sizes = [2, 32], strides = [1, 1]} : vector<2x96xf32> to vector<2x32xf32>
    %447 = arith.addf %445, %446 : vector<2x32xf32>
    %448 = arith.negf %447 : vector<2x32xf32>
    %449 = math.exp %448 : vector<2x32xf32>
    %cst_96 = arith.constant 1.000000e+00 : f32
    %450 = vector.broadcast %cst_96 : f32 to vector<2x32xf32>
    %451 = arith.addf %450, %449 : vector<2x32xf32>
    %452 = arith.divf %450, %451 : vector<2x32xf32>
    %453 = vector.extract_strided_slice %442 {offsets = [0, 32], sizes = [2, 32], strides = [1, 1]} : vector<2x96xf32> to vector<2x32xf32>
    %454 = vector.extract_strided_slice %444 {offsets = [0, 32], sizes = [2, 32], strides = [1, 1]} : vector<2x96xf32> to vector<2x32xf32>
    %455 = arith.addf %453, %454 : vector<2x32xf32>
    %456 = arith.negf %455 : vector<2x32xf32>
    %457 = math.exp %456 : vector<2x32xf32>
    %cst_97 = arith.constant 1.000000e+00 : f32
    %458 = vector.broadcast %cst_97 : f32 to vector<2x32xf32>
    %459 = arith.addf %458, %457 : vector<2x32xf32>
    %460 = arith.divf %458, %459 : vector<2x32xf32>
    %461 = vector.extract_strided_slice %442 {offsets = [0, 64], sizes = [2, 32], strides = [1, 1]} : vector<2x96xf32> to vector<2x32xf32>
    %462 = vector.extract_strided_slice %444 {offsets = [0, 64], sizes = [2, 32], strides = [1, 1]} : vector<2x96xf32> to vector<2x32xf32>
    %463 = arith.mulf %452, %462 : vector<2x32xf32>
    %464 = arith.addf %461, %463 : vector<2x32xf32>
    %465 = math.tanh %464 : vector<2x32xf32>
    %cst_98 = arith.constant 1.000000e+00 : f32
    %466 = vector.broadcast %cst_98 : f32 to vector<2x32xf32>
    %467 = arith.subf %466, %460 : vector<2x32xf32>
    %468 = arith.mulf %467, %465 : vector<2x32xf32>
    %469 = arith.mulf %460, %435 : vector<2x32xf32>
    %470 = arith.addf %468, %469 : vector<2x32xf32>
    %471 = vector.extract_strided_slice %28 {offsets = [12, 0], sizes = [2, 96], strides = [1, 1]} : vector<16x96xf32> to vector<2x96xf32>
    %c0_99 = arith.constant 0 : index
    %c0_100 = arith.constant 0 : index
    %472 = vector.load %arg6[%c0_99, %c0_100] : memref<2x96xf32, #tpu.memory_space<vmem>>, vector<2x96xf32>
    tpu.vector_store %arg6[%c0_99, %c0_100], %471 {strides = array<i32>} : memref<2x96xf32, #tpu.memory_space<vmem>>, vector<2x96xf32>,
    %c6 = arith.constant 6 : index
    %473 = memref.load %arg0[%c6] : memref<8xi32, #tpu.memory_space<smem>>
    %c0_i32_101 = arith.constant 0 : i32
    %474 = arith.cmpi eq, %473, %c0_i32_101 : i32
    %475 = arith.extui %474 : i1 to i32
    %c0_i32_102 = arith.constant 0 : i32
    %476 = arith.cmpi ne, %475, %c0_i32_102 : i32
    scf.if %476 {
      %cst_119 = arith.constant dense<0.000000e+00> : vector<2x16xf32>
      %523 = tpu.matmul %470, %11, %cst_119 {dimension_numbers = #tpu.dot_dimension_numbers<[1], [0], [0], [1], [0, 0, 1, 1], [], []>} : vector<2x32xf32>, vector<32x16xf32>, vector<2x16xf32> -> vector<2x16xf32>
      %524 = arith.addf %523, %22 : vector<2x16xf32>
      %525 = tpu.iota {dimensions = array<i32: 1>} : vector<2x16xi32>
      %cst_120 = arith.constant dense<0xFF800000> : vector<2xf32>
      %526 = vector.multi_reduction <maximumf>, %524, %cst_120 [1] : vector<2x16xf32> to vector<2xf32>
      %527 = vector.shape_cast %526 : vector<2xf32> to vector<2x1xf32>
      %528 = vector.broadcast %527 : vector<2x1xf32> to vector<2x16xf32>
      %529 = arith.cmpf oeq, %524, %528 : vector<2x16xf32>
      %c16_i32 = arith.constant 16 : i32
      %530 = vector.broadcast %c16_i32 : i32 to vector<2x16xi32>
      %531 = arith.select %529, %525, %530 : vector<2x16xi1>, vector<2x16xi32>
      %cst_121 = arith.constant dense<2147483647> : vector<2xi32>
      %532 = vector.multi_reduction <minsi>, %531, %cst_121 [1] : vector<2x16xi32> to vector<2xi32>
      %533 = vector.shape_cast %532 : vector<2xi32> to vector<2x1xi32>
      %534 = vector.broadcast %533 : vector<2x1xi32> to vector<2x16xi32>
      %535 = arith.cmpi eq, %525, %534 : vector<2x16xi32>
      %536 = arith.extui %535 : vector<2x16xi1> to vector<2x16xi32>
      %537 = arith.sitofp %536 : vector<2x16xi32> to vector<2x16xf32>
      %cst_122 = arith.constant dense<0.000000e+00> : vector<2x96xf32>
      %538 = tpu.matmul %537, %31, %cst_122 {dimension_numbers = #tpu.dot_dimension_numbers<[1], [0], [0], [1], [0, 0, 1, 1], [], []>} : vector<2x16xf32>, vector<16x96xf32>, vector<2x96xf32> -> vector<2x96xf32>
      %c0_123 = arith.constant 0 : index
      %c0_124 = arith.constant 0 : index
      %539 = vector.load %arg6[%c0_123, %c0_124] : memref<2x96xf32, #tpu.memory_space<vmem>>, vector<2x96xf32>
      tpu.vector_store %arg6[%c0_123, %c0_124], %538 {strides = array<i32>} : memref<2x96xf32, #tpu.memory_space<vmem>>, vector<2x96xf32>,
    } else {
    }
    %c0_103 = arith.constant 0 : index
    %c0_104 = arith.constant 0 : index
    %477 = vector.load %arg6[%c0_103, %c0_104] : memref<2x96xf32, #tpu.memory_space<vmem>>, vector<2x96xf32>
    %cst_105 = arith.constant dense<0.000000e+00> : vector<2x96xf32>
    %478 = tpu.matmul %470, %4, %cst_105 {dimension_numbers = #tpu.dot_dimension_numbers<[1], [0], [0], [1], [0, 0, 1, 1], [], []>} : vector<2x32xf32>, vector<32x96xf32>, vector<2x96xf32> -> vector<2x96xf32>
    %479 = arith.addf %478, %20 : vector<2x96xf32>
    %480 = vector.extract_strided_slice %477 {offsets = [0, 0], sizes = [2, 32], strides = [1, 1]} : vector<2x96xf32> to vector<2x32xf32>
    %481 = vector.extract_strided_slice %479 {offsets = [0, 0], sizes = [2, 32], strides = [1, 1]} : vector<2x96xf32> to vector<2x32xf32>
    %482 = arith.addf %480, %481 : vector<2x32xf32>
    %483 = arith.negf %482 : vector<2x32xf32>
    %484 = math.exp %483 : vector<2x32xf32>
    %cst_106 = arith.constant 1.000000e+00 : f32
    %485 = vector.broadcast %cst_106 : f32 to vector<2x32xf32>
    %486 = arith.addf %485, %484 : vector<2x32xf32>
    %487 = arith.divf %485, %486 : vector<2x32xf32>
    %488 = vector.extract_strided_slice %477 {offsets = [0, 32], sizes = [2, 32], strides = [1, 1]} : vector<2x96xf32> to vector<2x32xf32>
    %489 = vector.extract_strided_slice %479 {offsets = [0, 32], sizes = [2, 32], strides = [1, 1]} : vector<2x96xf32> to vector<2x32xf32>
    %490 = arith.addf %488, %489 : vector<2x32xf32>
    %491 = arith.negf %490 : vector<2x32xf32>
    %492 = math.exp %491 : vector<2x32xf32>
    %cst_107 = arith.constant 1.000000e+00 : f32
    %493 = vector.broadcast %cst_107 : f32 to vector<2x32xf32>
    %494 = arith.addf %493, %492 : vector<2x32xf32>
    %495 = arith.divf %493, %494 : vector<2x32xf32>
    %496 = vector.extract_strided_slice %477 {offsets = [0, 64], sizes = [2, 32], strides = [1, 1]} : vector<2x96xf32> to vector<2x32xf32>
    %497 = vector.extract_strided_slice %479 {offsets = [0, 64], sizes = [2, 32], strides = [1, 1]} : vector<2x96xf32> to vector<2x32xf32>
    %498 = arith.mulf %487, %497 : vector<2x32xf32>
    %499 = arith.addf %496, %498 : vector<2x32xf32>
    %500 = math.tanh %499 : vector<2x32xf32>
    %cst_108 = arith.constant 1.000000e+00 : f32
    %501 = vector.broadcast %cst_108 : f32 to vector<2x32xf32>
    %502 = arith.subf %501, %495 : vector<2x32xf32>
    %503 = arith.mulf %502, %500 : vector<2x32xf32>
    %504 = arith.mulf %495, %470 : vector<2x32xf32>
    %505 = arith.addf %503, %504 : vector<2x32xf32>
    %cst_109 = arith.constant 0.000000e+00 : f32
    %506 = vector.broadcast %cst_109 : f32 to vector<2x16xf32>
    %cst_110 = arith.constant dense<0.000000e+00> : vector<2x16xf32>
    %507 = tpu.matmul %295, %11, %cst_110 {dimension_numbers = #tpu.dot_dimension_numbers<[1], [0], [0], [1], [0, 0, 1, 1], [], []>} : vector<2x32xf32>, vector<32x16xf32>, vector<2x16xf32> -> vector<2x16xf32>
    %508 = arith.addf %507, %22 : vector<2x16xf32>
    %cst_111 = arith.constant dense<0.000000e+00> : vector<2x16xf32>
    %509 = tpu.matmul %330, %11, %cst_111 {dimension_numbers = #tpu.dot_dimension_numbers<[1], [0], [0], [1], [0, 0, 1, 1], [], []>} : vector<2x32xf32>, vector<32x16xf32>, vector<2x16xf32> -> vector<2x16xf32>
    %510 = arith.addf %509, %22 : vector<2x16xf32>
    %cst_112 = arith.constant dense<0.000000e+00> : vector<2x16xf32>
    %511 = tpu.matmul %365, %11, %cst_112 {dimension_numbers = #tpu.dot_dimension_numbers<[1], [0], [0], [1], [0, 0, 1, 1], [], []>} : vector<2x32xf32>, vector<32x16xf32>, vector<2x16xf32> -> vector<2x16xf32>
    %512 = arith.addf %511, %22 : vector<2x16xf32>
    %cst_113 = arith.constant dense<0.000000e+00> : vector<2x16xf32>
    %513 = tpu.matmul %400, %11, %cst_113 {dimension_numbers = #tpu.dot_dimension_numbers<[1], [0], [0], [1], [0, 0, 1, 1], [], []>} : vector<2x32xf32>, vector<32x16xf32>, vector<2x16xf32> -> vector<2x16xf32>
    %514 = arith.addf %513, %22 : vector<2x16xf32>
    %cst_114 = arith.constant dense<0.000000e+00> : vector<2x16xf32>
    %515 = tpu.matmul %435, %11, %cst_114 {dimension_numbers = #tpu.dot_dimension_numbers<[1], [0], [0], [1], [0, 0, 1, 1], [], []>} : vector<2x32xf32>, vector<32x16xf32>, vector<2x16xf32> -> vector<2x16xf32>
    %516 = arith.addf %515, %22 : vector<2x16xf32>
    %cst_115 = arith.constant dense<0.000000e+00> : vector<2x16xf32>
    %517 = tpu.matmul %470, %11, %cst_115 {dimension_numbers = #tpu.dot_dimension_numbers<[1], [0], [0], [1], [0, 0, 1, 1], [], []>} : vector<2x32xf32>, vector<32x16xf32>, vector<2x16xf32> -> vector<2x16xf32>
    %518 = arith.addf %517, %22 : vector<2x16xf32>
    %cst_116 = arith.constant dense<0.000000e+00> : vector<2x16xf32>
    %519 = tpu.matmul %505, %11, %cst_116 {dimension_numbers = #tpu.dot_dimension_numbers<[1], [0], [0], [1], [0, 0, 1, 1], [], []>} : vector<2x32xf32>, vector<32x16xf32>, vector<2x16xf32> -> vector<2x16xf32>
    %520 = arith.addf %519, %22 : vector<2x16xf32>
    %521 = tpu.concatenate %506, %508, %510, %512, %514, %516, %518, %520 in 1 : vector<2x16xf32>, vector<2x16xf32>, vector<2x16xf32>, vector<2x16xf32>, vector<2x16xf32>, vector<2x16xf32>, vector<2x16xf32>, vector<2x16xf32> -> vector<2x128xf32>
    %c0_117 = arith.constant 0 : index
    %c0_118 = arith.constant 0 : index
    %522 = vector.load %arg5[%c0_117, %c0_118] : memref<2x128xf32, #tpu.memory_space<vmem>>, vector<2x128xf32>
    tpu.vector_store %arg5[%c0_117, %c0_118], %521 {strides = array<i32>} : memref<2x128xf32, #tpu.memory_space<vmem>>, vector<2x128xf32>,
    return
  }
}

</mosaic_0001>

<bundles_post_ra>
// kernel: seq2seq_vanilla.1
= control target key start
LH: loop header
LB: loop body
LE: loop exit
PB: predicated region body
PF: predicated region fallthrough
CT: control target
= control target key end

     0   :  { %10 = vsyncpa [#allocation4], 0  ;;  %s5032_s0 = inlined_call_operand.vmem [shape: s32[8], index: 0, kind: input, shape index: {}]   ;;  %s5033_s1 = inlined_call_operand.vmem [shape: f32[48,16], index: 1, kind: input, shape index: {}]   ;;  %s5034_s2 = inlined_call_operand.vmem [shape: f32[96,96], index: 2, kind: input, shape index: {}]   ;;  %s5035_s3 = inlined_call_operand.vmem [shape: f32[4,96], index: 3, kind: input, shape index: {}]   ;;  %s5036_s4 = inlined_call_operand.vmem [shape: f32[33,16], index: 4, kind: input, shape index: {}]   ;;  %s5037_s5 = inlined_call_operand.vmem [shape: f32[2,128], index: 5, kind: output, shape index: {}]  }
   0x1   :  { %s17_s20 = sshll.u32 %s5032_s0, 4  ;;  %s18_s20 = int_to_ptr.vmem [resolvable:$true] %s17_s20 }
   0x2   :  { %s4443_s21 = scalar_lea.vmem %s18_s20, 16  ;;  %p4448_p1 = scmp.lt.s32.totalorder %s18_s20, %s18_s20 }
   0x3   :  { %p4444_p0 = scmp.ne.s32.totalorder %s18_s20, %s4443_s21  ;;  %p4449_p2 = scmp.lt.s32.totalorder %s4443_s21, %s4443_s21 }
   0x5   :  { %p4450_p3 = por %p4449_p2, %p4448_p1 }
   0x7   :  { %p4451_p4 = pnand %p4450_p3, %p4444_p0 }
   0x9   :  { %4454 = shalt.err (!%p4451_p4)
}
   0xa   :  { %s4457_s22 = smov [#allocation3]  }
   0xb   :  { %20 = dma.vmem_to_smem %s18_s20, 16, %s4457_s22, [#allocation4]  }
   0xc   :  { %4455 = dma.done.wait [#allocation4], 16  }
   0xd   :  { %4456 = vsyncadd [#allocation4], 4294967280 }
   0xe   :  { %32 = sfence }
   0xf   :  { %v39_v0 = vld [vmem:[%s5034_s2 + $0x30] sm:$0xff]  ;;  %v40_v1 = vld [vmem:[%s5034_s2 + $0x38] sm:$0xff]  ;;  %vm73_vm0 = vcmask 130048   ;;  %v33_v6 = vld [vmem:[%s5034_s2] sm:$0xff]  ;;  %v4458_v16 = vmov 0.0|0.0   ;;  %vm4459_vm1 = vmmov 0   ;;  %v57_v23 = vlaneseq }
  0x10   :  { %v53_v2 = vld [vmem:[%s5033_s1 + $0x10] sm:$0xff]  ;;  %v4124_v3 = vpack.c.bf16 %v40_v1, %v39_v0  ;;  %v36_v5 = vld [vmem:[%s5034_s2 + $0x18] sm:$0xff]  ;;  %v34_v7 = vld [vmem:[%s5034_s2 + $0x8] sm:$0xff]  ;;  %v4460_v22 = vmov 0.0   ;;  %vm1158_vm2 = vcmask 779264   ;;  %vm1264_vm3 = vcmask 781314  }
  0x11   :  { %3760 = vmatprep.mubr.msk.f32.mxu1 %vm73_vm0, %v53_v2  ;;  %v35_v4 = vld [vmem:[%s5034_s2 + $0x10] sm:$0xff]  ;;  %v4550_v8 = vld [vmem:[%s5036_s4] sm:$0xff]  ;;  %v4555_v9 = vld [vmem:[%s5036_s4 + $0x8] sm:$0xff]  ;;  %v4120_v12 = vpack.c.bf16 %v34_v7, %v33_v6  ;;  %v4610_v24 = vshrl.u32 %v57_v23, 7  ;;  %s4462_s10 = smov 96   ;;  %vm321_vm4 = vcmask 261120  }
  0x12   :  { %4125 = vmatprep.subr.bf16.mxu1 %v4124_v3  ;;  %v4560_v10 = vld [vmem:[%s5036_s4 + $0x10] sm:$0xff]  ;;  %v4565_v11 = vld [vmem:[%s5036_s4 + $0x18] sm:$0xff]  ;;  %v4570_v14 = vpack.c.bf16 %v36_v5, %v35_v4  ;;  %v4575_v15 = vld [vmem:[%s5036_s4 + $0x20] ss:$0 sm:$0xff] }
  0x13   :  { %4127 = vmatpush3.bf16.msra.mxu1 %v4124_v3  ;;  %v54_v13 = vld [vmem:[%s5033_s1 + $0x18] sm:$0xff]  ;;  %4121 = vmatprep.subr.bf16.mxu0 %v4120_v12  ;;  %v37_v17 = vld [vmem:[%s5034_s2 + $0x20] sm:$0xff]  ;;  %v38_v18 = vld [vmem:[%s5034_s2 + $0x28] sm:$0xff]  ;;  %v157_v25 = vsub.s32 2, %v4610_v24  ;;  %v71_v28 = vsub.s32 0, %v4610_v24  ;;  %v59_v30 = vsub.s32 1, %v4610_v24 }
  0x14   :  { %4132 = vmatprep.subr.bf16.mxu1 %v4458_v16  ;;  %v51_v19 = vld [vmem:[%s5033_s1] sm:$0xff]  ;;  %4123 = vmatpush3.bf16.msra.mxu0 %v4120_v12  ;;  %v52_v20 = vld [vmem:[%s5033_s1 + $0x8] sm:$0xff]  ;;  %v4593_v21 = vpack.c.bf16 %v38_v18, %v37_v17 }
  0x15   :  { %3753 = vmatprep.mubr.msk.f32.mxu0 %vm73_vm0, %v51_v19  ;;  %4129 = vmatprep.subr.bf16.mxu0 %v4124_v3  ;;  %v4616_v26 = vld [vmem:[%s5035_s3] sm:$0xf]  ;;  %s4461_s3 = smov 64   ;;  %v56_v54 = vld [vmem:[%s5033_s1 + $0x28] sm:$0xff] }
  0x16   :  { %3761 = vmatmul.mubr.msk.f32.vlgmr.msra.gmra.mrb[0].mxu1 %vm73_vm0, %v54_v13  ;;  %v158_v27 = vrot.slane %v4616_v26, %v157_v25  ;;  %v72_v33 = vrot.slane %v4616_v26, %v71_v28  ;;  %v4631_v38 = vrot.slane %v4616_v26, %v59_v30  ;;  %v55_v53 = vld [vmem:[%s5033_s1 + $0x20] sm:$0xff] }
  0x17   :  { %4134 = vmatpush3.bf16.msra.mxu1 %v4570_v14  ;;  %3778 = vmatprep.mubr.msk.f32.mxu1 %vm4459_vm1, %v4460_v22 }
  0x18   :  { %4135 = vmatprep.subr.bf16.mxu1 %v4458_v16  ;;  %3754 = vmatmul.mubr.msk.f32.vlgmr.msra.gmra.mrb[0].mxu0 %vm73_vm0, %v52_v20 }
  0x19   :  { %4131 = vmatpush3.bf16.msra.mxu0 %v4124_v3  ;;  %3767 = vmatprep.mubr.msk.f32.mxu0 %vm73_vm0, %v55_v53 }
  0x1a   :  { %4138 = vmatprep.subr.bf16.mxu0 %v4458_v16 }
  0x1b   :  { %4137 = vmatpush3.bf16.msra.mxu1 %v4593_v21 }
  0x1c   :  { %4144 = vmatprep.subr.bf16.mxu1 %v4458_v16  ;;  %3768 = vmatmul.mubr.msk.f32.vlgmr.msra.gmra.mrb[2].mxu0 %vm73_vm0, %v56_v54 }
  0x1d   :  { %4140 = vmatpush3.bf16.msra.mxu0 %v4570_v14  ;;  %3789 = vmatprep.mubr.msk.f32.mxu0 %vm4459_vm1, %v4460_v22 }
  0x1e   :  { %3779 = vmatmul.mubr.f32.vlgmr.msra.gmra.mrb[2].mxu1 %v4460_v22  ;;  %4141 = vmatprep.subr.bf16.mxu0 %v4458_v16 }
  0x1f   :  { %4146 = vmatpush3.bf16.msra.mxu1 %v4570_v14  ;;  %3800 = vmatprep.mubr.msk.f32.mxu1 %vm4459_vm1, %v4460_v22 }
  0x20   :  { %4147 = vmatprep.subr.bf16.mxu1 %v4458_v16 }
  0x21   :  { %4143 = vmatpush3.bf16.msra.mxu0 %v4593_v21 }
  0x22   :  { %4150 = vmatprep.subr.bf16.mxu0 %v4458_v16 }
  0x23   :  { %4149 = vmatpush3.bf16.msra.mxu1 %v4593_v21 }
  0x24   :  { %4156 = vmatprep.subr.bf16.mxu1 %v4458_v16 }
  0xe9   :  { %v3762_v29 = vpop.f32.mrb[0].mxu1 }
  0xea   :  { %v4621_v31 = vadd.f32 %v3762_v29, %v158_v27  ;;  %v231_v32 = vpop.f32.mrb[1].mxu1 }
  0xeb   :  { %v4624_v34 = vadd.f32 %v231_v32, %v158_v27  ;;  %v3755_v35 = vpop.f32.mrb[0].mxu0 }
  0xec   :  { %v4626_v36 = vadd.f32 %v3755_v35, %v72_v33  ;;  %v146_v37 = vpop.f32.mrb[1].mxu0 }
  0xed   :  { %1159 = vst.msk [vmem:[#allocation2] sm:$0x3] %vm1158_vm2, %v4624_v34  ;;  %v4639_v43 = vadd.f32 %v146_v37, %v72_v33 }
  0xef   :  { %v3769_v61 = vpop.f32.mrb[2].mxu0 }
  0xf0   :  { %v4660_v62 = vadd.f32 %v3769_v61, %v158_v27  ;;  %v312_v63 = vpop.f32.mrb[3].mxu0 }
  0xf1   :  { %v391_v39 = vpop.f32.mrb[2].mxu1  ;;  %v4662_v0 = vadd.f32 %v312_v63, %v158_v27 }
  0xf2   :  { %v392_v40 = vadd.f32 %v391_v39, %v4631_v38  ;;  %v3780_v41 = vpop.f32.mrb[3].mxu1 }
  0xf4   :  { %403 = vrot.lane.b32.xlu0 %v392_v40, %s4461_s3  ;;  %v4635_v42 = vld [vmem:[#allocation2] sm:$0x3]  ;;  %v395_v44 = vadd.f32 %v392_v40, %v4639_v43 }
  0xf5   :  { %1265 = vst.msk [vmem:[#allocation2 - $0x2] sm:$0xc] %vm1264_vm3, %v4624_v34 }
  0xf6   :  { %v3513_v45 = vmul.f32 -1.442695, %v395_v44 }
  0xf8   :  { %4353 = vpow2.f32 %v3513_v45 }
 0x102   :  { %v4354_v46 = vpop.eup %4353 }
 0x103   :  { %v399_v47 = vadd.f32 1.0, %v4354_v46 }
 0x105   :  { %4355 = vrcp.f32 %v399_v47 }
 0x10f   :  { %v4356_v48 = vpop.eup %4355 }
 0x110   :  { %v413_v56 = vsub.f32 1.0, %v4356_v48  ;;  %v419_v58 = vmul.f32 0.0, %v4356_v48 }
 0x166   :  { %v404_v49 = vpop.permute.xlu0 %403 }
 0x167   :  { %v406_v50 = vmul.f32 %v4356_v48, %v404_v49 }
 0x169   :  { %408 = vrot.lane.b32.xlu0 %v406_v50, %s4461_s3 }
 0x1db   :  { %v409_v51 = vpop.permute.xlu0 %408 }
 0x1dc   :  { %v411_v52 = vadd.f32 %v409_v51, %v4639_v43 }
 0x1de   :  { %4357 = vtanh.f32 %v411_v52 }
 0x1e8   :  { %v4358_v55 = vpop.eup %4357 }
 0x1e9   :  { %415 = vrot.lane.b32.xlu1 %v4358_v55, %s4462_s10 }
 0x25b   :  { %v416_v57 = vpop.permute.xlu1 %415 }
 0x25c   :  { %v418_v59 = vmul.f32 %v416_v57, %v413_v56 }
 0x25e   :  { %v420_v60 = vadd.f32 %v419_v58, %v418_v59 }
 0x260   :  { %422 = vrot.lane.b32.xlu1 %v420_v60, %s4462_s10  ;;  %v522_v28 = vrot.slane %v420_v60, 6 }
 0x2d2   :  { %v423_v1 = vpop.permute.xlu1 %422 }
 0x2d3   :  { %3790 = vmatmul.mubr.msk.f32.vlgmr.msra.gmra.mrb[4].mxu0 %vm321_vm4, %v423_v1 }
 0x2d4   :  { %4152 = vmatpush3.bf16.msra.mxu0 %v4570_v14  ;;  %3811 = vmatprep.mubr.msk.f32.mxu0 %vm4459_vm1, %v4460_v22 }
 0x2d5   :  { %4153 = vmatprep.subr.bf16.mxu0 %v4458_v16 }
 0x2d8   :  { %4155 = vmatpush3.bf16.msra.mxu0 %v4593_v21 }
 0x2d9   :  { %4162 = vmatprep.subr.bf16.mxu0 %v4458_v16 }
 0x3a6   :  { %v492_v2 = vpop.f32.mrb[4].mxu0 }
 0x3a7   :  { %v493_v3 = vadd.f32 %v492_v2, %v4631_v38  ;;  %v3791_v4 = vpop.f32.mrb[5].mxu0 }
 0x3a9   :  { %v497_v5 = vrot.slane %v493_v3, 6 }
 0x3ab   :  { %506 = vrot.lane.b32.xlu0 %v497_v5, %s4461_s3  ;;  %v499_v6 = vadd.f32 %v497_v5, %v4639_v43 }
 0x3ad   :  { %v3515_v7 = vmul.f32 -1.442695, %v499_v6 }
 0x3af   :  { %4359 = vpow2.f32 %v3515_v7 }
 0x3b9   :  { %v4360_v12 = vpop.eup %4359 }
 0x3ba   :  { %v503_v13 = vadd.f32 1.0, %v4360_v12 }
 0x3bc   :  { %4361 = vrcp.f32 %v503_v13 }
 0x3c6   :  { %v4362_v17 = vpop.eup %4361 }
 0x3c7   :  { %v516_v29 = vsub.f32 1.0, %v4362_v17  ;;  %v524_v33 = vmul.f32 %v4362_v17, %v522_v28 }
 0x41d   :  { %v507_v18 = vpop.permute.xlu0 %506 }
 0x41e   :  { %v509_v19 = vmul.f32 %v4362_v17, %v507_v18 }
 0x420   :  { %511 = vrot.lane.b32.xlu1 %v509_v19, %s4461_s3 }
 0x492   :  { %v512_v20 = vpop.permute.xlu1 %511 }
 0x493   :  { %v514_v25 = vadd.f32 %v512_v20, %v4639_v43 }
 0x495   :  { %4363 = vtanh.f32 %v514_v25 }
 0x49f   :  { %v4364_v27 = vpop.eup %4363 }
 0x4a0   :  { %518 = vrot.lane.b32.xlu0 %v4364_v27, %s4462_s10 }
 0x512   :  { %v519_v30 = vpop.permute.xlu0 %518 }
 0x513   :  { %v521_v32 = vmul.f32 %v519_v30, %v516_v29 }
 0x515   :  { %v525_v35 = vadd.f32 %v524_v33, %v521_v32 }
 0x517   :  { %v527_v37 = vrot.slane %v525_v35, 2  ;;  %v628_v56 = vrot.slane %v525_v35, 6 }
 0x519   :  { %528 = vrot.lane.b32.xlu1 %v527_v37, %s4462_s10 }
 0x58b   :  { %v529_v39 = vpop.permute.xlu1 %528 }
 0x58c   :  { %3801 = vmatmul.mubr.msk.f32.vlgmr.msra.gmra.mrb[4].mxu1 %vm321_vm4, %v529_v39 }
 0x58d   :  { %4158 = vmatpush3.bf16.msra.mxu1 %v4570_v14  ;;  %3822 = vmatprep.mubr.msk.f32.mxu1 %vm4459_vm1, %v4460_v22 }
 0x58e   :  { %4159 = vmatprep.subr.bf16.mxu1 %v4458_v16 }
 0x591   :  { %4161 = vmatpush3.bf16.msra.mxu1 %v4593_v21 }
 0x592   :  { %4168 = vmatprep.subr.bf16.mxu1 %v4458_v16 }
 0x65f   :  { %v598_v40 = vpop.f32.mrb[4].mxu1 }
 0x660   :  { %v599_v41 = vadd.f32 %v598_v40, %v4631_v38  ;;  %v3802_v44 = vpop.f32.mrb[5].mxu1 }
 0x662   :  { %v603_v45 = vrot.slane %v599_v41, 4 }
 0x664   :  { %612 = vrot.lane.b32.xlu0 %v603_v45, %s4461_s3  ;;  %v605_v46 = vadd.f32 %v603_v45, %v4639_v43 }
 0x666   :  { %v3517_v47 = vmul.f32 -1.442695, %v605_v46 }
 0x668   :  { %4365 = vpow2.f32 %v3517_v47 }
 0x672   :  { %v4366_v48 = vpop.eup %4365 }
 0x673   :  { %v609_v49 = vadd.f32 1.0, %v4366_v48 }
 0x675   :  { %4367 = vrcp.f32 %v609_v49 }
 0x67f   :  { %v4368_v50 = vpop.eup %4367 }
 0x680   :  { %v622_v57 = vsub.f32 1.0, %v4368_v50  ;;  %v630_v59 = vmul.f32 %v4368_v50, %v628_v56 }
 0x6d6   :  { %v613_v51 = vpop.permute.xlu0 %612 }
 0x6d7   :  { %v615_v52 = vmul.f32 %v4368_v50, %v613_v51 }
 0x6d9   :  { %617 = vrot.lane.b32.xlu1 %v615_v52, %s4461_s3 }
 0x74b   :  { %v618_v53 = vpop.permute.xlu1 %617 }
 0x74c   :  { %v620_v54 = vadd.f32 %v618_v53, %v4639_v43 }
 0x74e   :  { %4369 = vtanh.f32 %v620_v54 }
 0x758   :  { %v4370_v55 = vpop.eup %4369 }
 0x759   :  { %624 = vrot.lane.b32.xlu0 %v4370_v55, %s4462_s10 }
 0x7cb   :  { %v625_v58 = vpop.permute.xlu0 %624 }
 0x7cc   :  { %v627_v60 = vmul.f32 %v625_v58, %v622_v57 }
 0x7ce   :  { %v631_v61 = vadd.f32 %v630_v59, %v627_v60 }
 0x7d0   :  { %v633_v63 = vrot.slane %v631_v61, 4  ;;  %v734_v28 = vrot.slane %v631_v61, 6 }
 0x7d2   :  { %634 = vrot.lane.b32.xlu1 %v633_v63, %s4462_s10 }
 0x844   :  { %v635_v1 = vpop.permute.xlu1 %634 }
 0x845   :  { %3812 = vmatmul.mubr.msk.f32.vlgmr.msra.gmra.mrb[6].mxu0 %vm321_vm4, %v635_v1 }
 0x846   :  { %4164 = vmatpush3.bf16.msra.mxu0 %v4570_v14  ;;  %3833 = vmatprep.mubr.msk.f32.mxu0 %vm4459_vm1, %v4460_v22 }
 0x847   :  { %4165 = vmatprep.subr.bf16.mxu0 %v4458_v16 }
 0x84a   :  { %4167 = vmatpush3.bf16.msra.mxu0 %v4593_v21 }
 0x84b   :  { %4174 = vmatprep.subr.bf16.mxu0 %v4458_v16 }
 0x918   :  { %v704_v2 = vpop.f32.mrb[6].mxu0 }
 0x919   :  { %v705_v3 = vadd.f32 %v704_v2, %v4631_v38  ;;  %v3813_v4 = vpop.f32.mrb[7].mxu0 }
 0x91b   :  { %v709_v5 = vrot.slane %v705_v3, 2 }
 0x91d   :  { %718 = vrot.lane.b32.xlu0 %v709_v5, %s4461_s3  ;;  %v711_v6 = vadd.f32 %v709_v5, %v4639_v43 }
 0x91f   :  { %v3519_v7 = vmul.f32 -1.442695, %v711_v6 }
 0x921   :  { %4371 = vpow2.f32 %v3519_v7 }
 0x92b   :  { %v4372_v12 = vpop.eup %4371 }
 0x92c   :  { %v715_v13 = vadd.f32 1.0, %v4372_v12 }
 0x92e   :  { %4373 = vrcp.f32 %v715_v13 }
 0x938   :  { %v4374_v17 = vpop.eup %4373 }
 0x939   :  { %v728_v29 = vsub.f32 1.0, %v4374_v17  ;;  %v736_v32 = vmul.f32 %v4374_v17, %v734_v28 }
 0x98f   :  { %v719_v18 = vpop.permute.xlu0 %718 }
 0x990   :  { %v721_v19 = vmul.f32 %v4374_v17, %v719_v18 }
 0x992   :  { %723 = vrot.lane.b32.xlu1 %v721_v19, %s4461_s3 }
 0xa04   :  { %v724_v20 = vpop.permute.xlu1 %723 }
 0xa05   :  { %v726_v25 = vadd.f32 %v724_v20, %v4639_v43 }
 0xa07   :  { %4375 = vtanh.f32 %v726_v25 }
 0xa11   :  { %v4376_v27 = vpop.eup %4375 }
 0xa12   :  { %730 = vrot.lane.b32.xlu0 %v4376_v27, %s4462_s10 }
 0xa84   :  { %v731_v30 = vpop.permute.xlu0 %730 }
 0xa85   :  { %v733_v33 = vmul.f32 %v731_v30, %v728_v29 }
 0xa87   :  { %v737_v35 = vadd.f32 %v736_v32, %v733_v33 }
 0xa89   :  { %v739_v37 = vrot.slane %v737_v35, 6 }
 0xa8b   :  { %740 = vrot.lane.b32.xlu1 %v739_v37, %s4462_s10 }
 0xafd   :  { %v741_v39 = vpop.permute.xlu1 %740 }
 0xafe   :  { %3823 = vmatmul.mubr.msk.f32.vlgmr.msra.gmra.mrb[6].mxu1 %vm321_vm4, %v741_v39 }
 0xaff   :  { %4170 = vmatpush3.bf16.msra.mxu1 %v4570_v14  ;;  %3844 = vmatprep.mubr.msk.f32.mxu1 %vm4459_vm1, %v4460_v22 }
 0xb00   :  { %4171 = vmatprep.subr.bf16.mxu1 %v4458_v16 }
 0xb03   :  { %4173 = vmatpush3.bf16.msra.mxu1 %v4593_v21 }
 0xb04   :  { %4180 = vmatprep.subr.bf16.mxu1 %v4458_v16 }
 0xbd1   :  { %v810_v43 = vpop.f32.mrb[6].mxu1 }
 0xbd2   :  { %v811_v40 = vadd.f32 %v810_v43, %v4631_v38  ;;  %v3824_v41 = vpop.f32.mrb[7].mxu1 }
 0xbd4   :  { %822 = vrot.lane.b32.xlu0 %v811_v40, %s4461_s3  ;;  %v814_v44 = vadd.f32 %v811_v40, %v4626_v36 }
 0xbd6   :  { %v3521_v45 = vmul.f32 -1.442695, %v814_v44 }
 0xbd8   :  { %4377 = vpow2.f32 %v3521_v45 }
 0xbe2   :  { %v4378_v46 = vpop.eup %4377 }
 0xbe3   :  { %v818_v47 = vadd.f32 1.0, %v4378_v46 }
 0xbe5   :  { %4379 = vrcp.f32 %v818_v47 }
 0xbef   :  { %v4380_v48 = vpop.eup %4379 }
 0xbf0   :  { %v832_v54 = vsub.f32 1.0, %v4380_v48  ;;  %v839_v56 = vmul.f32 %v4380_v48, %v739_v37 }
 0xc46   :  { %v823_v49 = vpop.permute.xlu0 %822 }
 0xc47   :  { %v825_v50 = vmul.f32 %v4380_v48, %v823_v49 }
 0xc49   :  { %827 = vrot.lane.b32.xlu1 %v825_v50, %s4461_s3 }
 0xcbb   :  { %v828_v51 = vpop.permute.xlu1 %827 }
 0xcbc   :  { %v830_v52 = vadd.f32 %v828_v51, %v4626_v36 }
 0xcbe   :  { %4381 = vtanh.f32 %v830_v52 }
 0xcc8   :  { %v4382_v53 = vpop.eup %4381 }
 0xcc9   :  { %834 = vrot.lane.b32.xlu0 %v4382_v53, %s4462_s10 }
 0xd3b   :  { %v835_v55 = vpop.permute.xlu0 %834 }
 0xd3c   :  { %v837_v57 = vmul.f32 %v835_v55, %v832_v54 }
 0xd3e   :  { %v840_v58 = vadd.f32 %v839_v56, %v837_v57 }
 0xd40   :  { %842 = vrot.lane.b32.xlu1 %v840_v58, %s4462_s10  ;;  %v942_v17 = vrot.slane %v840_v58, 6 }
 0xdb2   :  { %v843_v59 = vpop.permute.xlu1 %842 }
 0xdb3   :  { %3834 = vmatmul.mubr.msk.f32.vlgmr.msra.gmra.mrb[8].mxu0 %vm321_vm4, %v843_v59 }
 0xdb4   :  { %4176 = vmatpush3.bf16.msra.mxu0 %v4570_v14  ;;  %3855 = vmatprep.mubr.msk.f32.mxu0 %vm4459_vm1, %v4460_v22 }
 0xdb5   :  { %4177 = vmatprep.subr.bf16.mxu0 %v4458_v16 }
 0xdb8   :  { %4179 = vmatpush3.bf16.msra.mxu0 %v4593_v21 }
 0xe86   :  { %v912_v60 = vpop.f32.mrb[8].mxu0 }
 0xe87   :  { %v913_v61 = vadd.f32 %v912_v60, %v4631_v38  ;;  %v3835_v63 = vpop.f32.mrb[9].mxu0 }
 0xe89   :  { %v917_v1 = vrot.slane %v913_v61, 6 }
 0xe8b   :  { %926 = vrot.lane.b32.xlu0 %v917_v1, %s4461_s3  ;;  %v919_v2 = vadd.f32 %v917_v1, %v4626_v36 }
 0xe8d   :  { %v3523_v3 = vmul.f32 -1.442695, %v919_v2 }
 0xe8f   :  { %4383 = vpow2.f32 %v3523_v3 }
 0xe99   :  { %v4384_v4 = vpop.eup %4383 }
 0xe9a   :  { %v923_v14 = vadd.f32 1.0, %v4384_v4 }
 0xe9c   :  { %4385 = vrcp.f32 %v923_v14 }
 0xea6   :  { %v4386_v5 = vpop.eup %4385 }
 0xea7   :  { %v936_v18 = vsub.f32 1.0, %v4386_v5  ;;  %v944_v25 = vmul.f32 %v4386_v5, %v942_v17 }
 0xefd   :  { %v927_v6 = vpop.permute.xlu0 %926 }
 0xefe   :  { %v929_v7 = vmul.f32 %v4386_v5, %v927_v6 }
 0xf00   :  { %931 = vrot.lane.b32.xlu1 %v929_v7, %s4461_s3  ;;  %v42_v7 = vld [vmem:[%s5034_s2 + $0x48] sm:$0xff] }
 0xf72   :  { %v932_v21 = vpop.permute.xlu1 %931 }
 0xf73   :  { %v934_v12 = vadd.f32 %v932_v21, %v4626_v36  ;;  %v43_v21 = vld [vmem:[%s5034_s2 + $0x50] sm:$0xff] }
 0xf75   :  { %4387 = vtanh.f32 %v934_v12 }
 0xf7f   :  { %v4388_v13 = vpop.eup %4387 }
 0xf80   :  { %938 = vrot.lane.b32.xlu0 %v4388_v13, %s4462_s10  ;;  %v44_v13 = vld [vmem:[%s5034_s2 + $0x58] sm:$0xff] }
 0xff2   :  { %v939_v19 = vpop.permute.xlu0 %938 }
 0xff3   :  { %v941_v20 = vmul.f32 %v939_v19, %v936_v18 }
 0xff5   :  { %v945_v27 = vadd.f32 %v944_v25, %v941_v20 }
 0xff7   :  { %v947_v28 = vrot.slane %v945_v27, 2  ;;  %v1048_v49 = vrot.slane %v945_v27, 6 }
 0xff9   :  { %948 = vrot.lane.b32.xlu1 %v947_v28, %s4462_s10 }
0x106b   :  { %v949_v29 = vpop.permute.xlu1 %948 }
0x106c   :  { %3845 = vmatmul.mubr.msk.f32.vlgmr.msra.gmra.mrb[8].mxu1 %vm321_vm4, %v949_v29 }
0x106d   :  { %3866 = vmatprep.mubr.msk.f32.mxu1 %vm4459_vm1, %v4460_v22 }
0x113f   :  { %v1018_v30 = vpop.f32.mrb[8].mxu1 }
0x1140   :  { %v1019_v32 = vadd.f32 %v1018_v30, %v4631_v38  ;;  %v3846_v33 = vpop.f32.mrb[9].mxu1 }
0x1142   :  { %v1023_v35 = vrot.slane %v1019_v32, 4  ;;  %v63_v32 = vsub.s32 3, %v4610_v24 }
0x1144   :  { %1032 = vrot.lane.b32.xlu0 %v1023_v35, %s4461_s3  ;;  %v1025_v37 = vadd.f32 %v1023_v35, %v4626_v36  ;;  %v4773_v33 = vrot.slane %v4616_v26, %v63_v32 }
0x1146   :  { %v3525_v39 = vmul.f32 -1.442695, %v1025_v37 }
0x1148   :  { %4389 = vpow2.f32 %v3525_v39 }
0x1152   :  { %v4390_v43 = vpop.eup %4389 }
0x1153   :  { %v1029_v40 = vadd.f32 1.0, %v4390_v43 }
0x1155   :  { %4391 = vrcp.f32 %v1029_v40 }
0x115f   :  { %v4392_v41 = vpop.eup %4391 }
0x1160   :  { %v1042_v50 = vsub.f32 1.0, %v4392_v41  ;;  %v1050_v52 = vmul.f32 %v4392_v41, %v1048_v49 }
0x11b6   :  { %v1033_v44 = vpop.permute.xlu0 %1032 }
0x11b7   :  { %v1035_v45 = vmul.f32 %v4392_v41, %v1033_v44 }
0x11b9   :  { %1037 = vrot.lane.b32.xlu1 %v1035_v45, %s4461_s3 }
0x122b   :  { %v1038_v46 = vpop.permute.xlu1 %1037 }
0x122c   :  { %v1040_v47 = vadd.f32 %v1038_v46, %v4626_v36 }
0x122e   :  { %4393 = vtanh.f32 %v1040_v47 }
0x1238   :  { %v4394_v48 = vpop.eup %4393 }
0x1239   :  { %1044 = vrot.lane.b32.xlu0 %v4394_v48, %s4462_s10 }
0x12ab   :  { %v1045_v51 = vpop.permute.xlu0 %1044 }
0x12ac   :  { %v1047_v53 = vmul.f32 %v1045_v51, %v1042_v50 }
0x12ae   :  { %v1051_v54 = vadd.f32 %v1050_v52, %v1047_v53 }
0x12b0   :  { %v1053_v55 = vrot.slane %v1051_v54, 4  ;;  %v1154_v18 = vrot.slane %v1051_v54, 6 }
0x12b2   :  { %1054 = vrot.lane.b32.xlu1 %v1053_v55, %s4462_s10 }
0x1324   :  { %v1055_v56 = vpop.permute.xlu1 %1054 }
0x1325   :  { %3856 = vmatmul.mubr.msk.f32.vlgmr.msra.gmra.mrb[10].mxu0 %vm321_vm4, %v1055_v56 }
0x13f8   :  { %v1124_v57 = vpop.f32.mrb[10].mxu0 }
0x13f9   :  { %v1125_v58 = vadd.f32 %v1124_v57, %v4631_v38  ;;  %v3857_v59 = vpop.f32.mrb[11].mxu0  ;;  %v41_v38 = vld [vmem:[%s5034_s2 + $0x40] sm:$0xff]  ;;  %s3530_s2 = sld [smem:[#allocation3 + $0x1]] }
0x13fa   :  { %v4758_v12 = vpack.c.bf16 %v42_v7, %v41_v38 }
0x13fb   :  { %v1129_v60 = vrot.slane %v1125_v58, 2 }
0x13fc   :  { %4182 = vmatpush3.bf16.msra.mxu1 %v4758_v12 }
0x13fd   :  { %1138 = vrot.lane.b32.xlu0 %v1129_v60, %s4461_s3  ;;  %v1131_v61 = vadd.f32 %v1129_v60, %v4626_v36  ;;  %4183 = vmatprep.subr.bf16.mxu1 %v4458_v16 }
0x13ff   :  { %v3527_v63 = vmul.f32 -1.442695, %v1131_v61  ;;  %p3531_p5 = scmp.ne.s32.totalorder %s3530_s2, 0 }
0x1400   :  { %v4187_v54 = vpack.c.bf16 (!%p3531_p5), %v4555_v9, %v4550_v8  ;;  %s4463_s18 = smov (!%p3531_p5), 96   ;;  %v4190_v55 = vpack.c.bf16 (!%p3531_p5), %v4565_v11, %v4560_v10  ;;  %vm4465_vm5 = vmmov (!%p3531_p5), 0   ;;  %v4466_v56 = vmov (!%p3531_p5), 0.0  }
0x1401   :  { %4395 = vpow2.f32 %v3527_v63  ;;  %3877 = vmatprep.mubr.msk.f32.mxu0 (!%p3531_p5), %vm4465_vm5, %v4466_v56  ;;  %vm1348_vm6 = vcmask (!%p3531_p5), 123904   ;;  %v1347_v63 = vand.u32 (!%p3531_p5), 127, %v57_v23 }
0x140b   :  { %v4396_v1 = vpop.eup %4395 }
0x140c   :  { %v1135_v2 = vadd.f32 1.0, %v4396_v1 }
0x140e   :  { %4397 = vrcp.f32 %v1135_v2 }
0x1418   :  { %v4398_v3 = vpop.eup %4397 }
0x1419   :  { %v1148_v19 = vsub.f32 1.0, %v4398_v3  ;;  %v1156_v25 = vmul.f32 %v4398_v3, %v1154_v18 }
0x146f   :  { %v1139_v4 = vpop.permute.xlu0 %1138 }
0x1470   :  { %v1141_v14 = vmul.f32 %v4398_v3, %v1139_v4 }
0x1472   :  { %1143 = vrot.lane.b32.xlu1 %v1141_v14, %s4461_s3 }
0x14e4   :  { %v1144_v5 = vpop.permute.xlu1 %1143 }
0x14e5   :  { %v1146_v6 = vadd.f32 %v1144_v5, %v4626_v36  ;;  %v4764_v36 = vpack.c.bf16 %v44_v13, %v43_v21  ;;  %v4193_v21 = vpack.c.bf16 (!%p3531_p5), %v4660_v62, %v4662_v0 }
0x14e7   :  { %4399 = vtanh.f32 %v1146_v6  ;;  %4185 = vmatpush3.bf16.msra.mxu1 %v4764_v36 }
0x14f1   :  { %v4400_v17 = vpop.eup %4399 }
0x14f2   :  { %1150 = vrot.lane.b32.xlu0 %v4400_v17, %s4462_s10 }
0x1564   :  { %v1151_v20 = vpop.permute.xlu0 %1150 }
0x1565   :  { %v1153_v27 = vmul.f32 %v1151_v20, %v1148_v19 }
0x1567   :  { %v1157_v28 = vadd.f32 %v1156_v25, %v1153_v27 }
0x1569   :  { %v1162_v29 = vrot.slane %v1157_v28, 6 }
0x156b   :  { %1163 = vrot.lane.b32.xlu1 %v1162_v29, %s4462_s10 }
0x15dd   :  { %v1164_v30 = vpop.permute.xlu1 %1163 }
0x15de   :  { %3867 = vmatmul.mubr.msk.f32.vlgmr.msra.gmra.mrb[10].mxu1 %vm321_vm4, %v1164_v30 }
0x15df   :  { %3884 = vmatprep.mubr.msk.f32.mxu1 (!%p3531_p5), %vm4465_vm5, %v4466_v56 }
0x16b1   :  { %v1233_v35 = vpop.f32.mrb[10].mxu1 }
0x16b2   :  { %v1234_v37 = vadd.f32 %v1233_v35, %v4773_v33  ;;  %v3868_v39 = vpop.f32.mrb[11].mxu1 }
0x16b4   :  { %1245 = vrot.lane.b32.xlu0 %v1234_v37, %s4461_s3  ;;  %v1237_v43 = vadd.f32 %v1234_v37, %v4635_v42 }
0x16b6   :  { %v3529_v40 = vmul.f32 -1.442695, %v1237_v43 }
0x16b8   :  { %4401 = vpow2.f32 %v3529_v40 }
0x16c2   :  { %v4402_v41 = vpop.eup %4401 }
0x16c3   :  { %v1241_v44 = vadd.f32 1.0, %v4402_v41 }
0x16c5   :  { %4403 = vrcp.f32 %v1241_v44 }
0x16cf   :  { %v4404_v45 = vpop.eup %4403 }
0x16d0   :  { %v1255_v49 = vsub.f32 1.0, %v4404_v45  ;;  %v1262_v51 = vmul.f32 %v4404_v45, %v1162_v29 }
0x1726   :  { %v1246_v46 = vpop.permute.xlu0 %1245 }
0x1727   :  { %v1248_v47 = vmul.f32 %v4404_v45, %v1246_v46 }
0x1729   :  { %1250 = vrot.lane.b32.xlu1 %v1248_v47, %s4461_s3 }
0x179b   :  { %v1251_v24 = vpop.permute.xlu1 %1250 }
0x179c   :  { %v1253_v26 = vadd.f32 %v1251_v24, %v4635_v42  ;;  %v4464_v42 = vmov (!%p3531_p5), 0.0|0.0  }
0x179d   :  { %4186 = vmatprep.subr.bf16.mxu0 (!%p3531_p5), %v4464_v42  ;;  %4192 = vmatprep.subr.bf16.mxu1 (!%p3531_p5), %v4464_v42 }
0x179e   :  { %4405 = vtanh.f32 %v1253_v26  ;;  %4188 = vmatpush3.bf16.msra.mxu0 (!%p3531_p5), %v4187_v54  ;;  %4194 = vmatpush3.bf16.msra.mxu1 (!%p3531_p5), %v4193_v21 }
0x179f   :  { %4189 = vmatprep.subr.bf16.mxu0 (!%p3531_p5), %v4464_v42 }
0x17a2   :  { %4191 = vmatpush3.bf16.msra.mxu0 (!%p3531_p5), %v4190_v55 }
0x17a8   :  { %v4406_v48 = vpop.eup %4405 }
0x17a9   :  { %1257 = vrot.lane.b32.xlu0 %v4406_v48, %s4462_s10 }
0x1818   :  { %1270 = sbr.rel (%p3531_p5) target bundleno = 7160 (0x1bf8), region = 29 }
0x181b   :  { %v1258_v50 = vpop.permute.xlu0 %1257 }
0x181c   :  { %v1260_v52 = vmul.f32 %v1258_v50, %v1255_v49 }
0x181e   :  { %v4781_v53 = vadd.f32 %v1262_v51, %v1260_v52 }
0x1820   :  { %1272 = vrot.lane.b32.xlu0 %v4781_v53, %s4463_s18 }
0x1892   :  { %v1273_v57 = vpop.permute.xlu0 %1272 }
0x1893   :  { %3878 = vmatmul.mubr.msk.f32.vlgmr.msra.gmra.mrb[0].mxu0 %vm321_vm4, %v1273_v57 }
0x1966   :  { %v1342_v58 = vpop.f32.mrb[0].mxu0 }
0x1967   :  { %v1343_v59 = vadd.f32 %v4575_v15, %v1342_v58  ;;  %v3879_v60 = vpop.f32.mrb[1].mxu0 }
0x1969   :  { %v1349_v61 = vsel %vm1348_vm6, %v1343_v59, -inf }
0x196a   :  { %1350 = vmax.xlane.f32.xlu0 %v1349_v61 }
0x19f7   :  { %v1351_v1 = vpop.xlane.xlu0 %1350 }
0x19f8   :  { %vm1352_vm7 = vcmp.eq.f32.partialorder %v1343_v59, %v1351_v1 }
0x19f9   :  { %v1353_v2 = vsel %vm1352_vm7, %v1347_v63, 16 }
0x19fa   :  { %v1354_v3 = vsel %vm1348_vm6, %v1353_v2, 2147483647 }
0x19fb   :  { %v1356_v4 = vshra.s32 %v1354_v3, 16  ;;  %v1355_v5 = vand.u32 65535, %v1354_v3 }
0x19fd   :  { %v1358_v14 = vcvt.s32.f32 %v1356_v4  ;;  %v1357_v38 = vcvt.s32.f32 %v1355_v5 }
0x19ff   :  { %1359 = vmin.xlane.f32.xlu1 %v1358_v14 }
0x1a8c   :  { %v1360_v6 = vpop.xlane.xlu1 %1359 }
0x1a8d   :  { %vm1361_vm8 = vcmp.eq.f32.partialorder %v1358_v14, %v1360_v6  ;;  %v1366_v13 = vcvt.f32.s32 %v1360_v6 }
0x1a8e   :  { %v1362_v7 = vsel %vm1361_vm8, %v1357_v38, inf }
0x1a8f   :  { %1363 = vmin.xlane.f32.xlu1 %v1362_v7  ;;  %v1367_v18 = vshll.u32 %v1366_v13, 16 }
0x1b1c   :  { %v1364_v17 = vpop.xlane.xlu1 %1363 }
0x1b1d   :  { %v1365_v19 = vcvt.f32.s32 %v1364_v17 }
0x1b1f   :  { %v1368_v20 = vadd.s32 %v1367_v18, %v1365_v19 }
0x1b21   :  { %vm1369_vm9 = vcmp.eq.s32.totalorder %v1347_v63, %v1368_v20 }
0x1b22   :  { %v3533_v25 = vsel %vm1369_vm9, 1.0, %v4466_v56 }
0x1b23   :  { %3885 = vmatmul.mubr.msk.f32.vlgmr.msra.gmra.mrb[0].mxu1 %vm73_vm0, %v3533_v25 }
0x1bf6   :  { %v1441_v27 = vpop.f32.mrb[0].mxu1 }
0x1bf7   :  { %1445 = vst.msk [vmem:[#allocation2] sm:$0x3] %vm1158_vm2, %v1441_v27  ;;  %v3886_v28 = vpop.f32.mrb[1].mxu1 }
0x1bf8 PF:  { %1448 = vrot.lane.b32.xlu0 %v4781_v53, %s4462_s10  ;;  %4195 = vmatprep.subr.bf16.mxu0 %v4458_v16  ;;  %vm1548_vm10 = vcmask 783364   ;;  %s3537_s19 = sld [smem:[#allocation3 + $0x2]] }
0x1bf9   :  { %4197 = vmatpush3.bf16.msra.mxu0 %v4758_v12  ;;  %3895 = vmatprep.mubr.msk.f32.mxu0 %vm4459_vm1, %v4460_v22 }
0x1bfa   :  { %4198 = vmatprep.subr.bf16.mxu0 %v4458_v16 }
0x1bfd   :  { %4200 = vmatpush3.bf16.msra.mxu0 %v4764_v36 }
0x1bfe   :  { %v1446_v30 = vld [vmem:[#allocation2] sm:$0x3]  ;;  %p3538_p6 = scmp.ne.s32.totalorder %s3537_s19, 0 }
0x1bff   :  { %1549 = vst.msk [vmem:[#allocation2 - $0x4] sm:$0x30] %vm1548_vm10, %v4624_v34  ;;  %v4202_v54 = vpack.c.bf16 (!%p3538_p6), %v4555_v9, %v4550_v8  ;;  %s4467_s20 = smov (!%p3538_p6), 96   ;;  %v4468_v42 = vmov (!%p3538_p6), 0.0|0.0   ;;  %v4205_v55 = vpack.c.bf16 (!%p3538_p6), %v4565_v11, %v4560_v10  ;;  %vm4469_vm11 = vmmov (!%p3538_p6), 0  }
0x1c00   :  { %4201 = vmatprep.subr.bf16.mxu0 (!%p3538_p6), %v4468_v42  ;;  %v4470_v56 = vmov (!%p3538_p6), 0.0   ;;  %4207 = vmatprep.subr.bf16.mxu1 (!%p3538_p6), %v4468_v42  ;;  %vm1632_vm12 = vcmask (!%p3538_p6), 123904   ;;  %v1631_v61 = vand.u32 (!%p3538_p6), 127, %v57_v23  ;;  %v4208_v7 = vpack.c.bf16 (!%p3538_p6), %v4660_v62, %v4662_v0 }
0x1c01   :  { %3913 = vmatprep.mubr.msk.f32.mxu1 (!%p3538_p6), %vm4469_vm11, %v4470_v56 }
0x1c02   :  { %4209 = vmatpush3.bf16.msra.mxu1 (!%p3538_p6), %v4208_v7 }
0x1c6a   :  { %v4803_v29 = vpop.permute.xlu0 %1448 }
0x1c6b   :  { %3896 = vmatmul.mubr.msk.f32.vlgmr.msra.gmra.mrb[0].mxu0 %vm321_vm4, %v4803_v29 }
0x1c6c   :  { %4203 = vmatpush3.bf16.msra.mxu0 (!%p3538_p6), %v4202_v54  ;;  %3906 = vmatprep.mubr.msk.f32.mxu0 (!%p3538_p6), %vm4469_vm11, %v4470_v56 }
0x1c6d   :  { %4204 = vmatprep.subr.bf16.mxu0 (!%p3538_p6), %v4468_v42 }
0x1c70   :  { %4206 = vmatpush3.bf16.msra.mxu0 (!%p3538_p6), %v4205_v55 }
0x1d3e   :  { %v1518_v32 = vpop.f32.mrb[0].mxu0 }
0x1d3f   :  { %v1519_v35 = vadd.f32 %v1518_v32, %v4773_v33  ;;  %v3897_v37 = vpop.f32.mrb[1].mxu0 }
0x1d41   :  { %1530 = vrot.lane.b32.xlu0 %v1519_v35, %s4461_s3  ;;  %v1522_v39 = vadd.f32 %v1519_v35, %v1446_v30 }
0x1d43   :  { %v3536_v43 = vmul.f32 -1.442695, %v1522_v39 }
0x1d45   :  { %4407 = vpow2.f32 %v3536_v43 }
0x1d4f   :  { %v4408_v40 = vpop.eup %4407 }
0x1d50   :  { %v1526_v41 = vadd.f32 1.0, %v4408_v40 }
0x1d52   :  { %4409 = vrcp.f32 %v1526_v41 }
0x1d5c   :  { %v4410_v44 = vpop.eup %4409 }
0x1d5d   :  { %v1540_v48 = vsub.f32 1.0, %v4410_v44  ;;  %v1546_v50 = vmul.f32 %v4410_v44, %v4781_v53 }
0x1db3   :  { %v1531_v45 = vpop.permute.xlu0 %1530 }
0x1db4   :  { %v1533_v46 = vmul.f32 %v4410_v44, %v1531_v45 }
0x1db6   :  { %1535 = vrot.lane.b32.xlu1 %v1533_v46, %s4461_s3 }
0x1e28   :  { %v1536_v47 = vpop.permute.xlu1 %1535 }
0x1e29   :  { %v1538_v24 = vadd.f32 %v1536_v47, %v1446_v30 }
0x1e2b   :  { %4411 = vtanh.f32 %v1538_v24 }
0x1e35   :  { %v4412_v26 = vpop.eup %4411 }
0x1e36   :  { %1542 = vrot.lane.b32.xlu1 %v4412_v26, %s4462_s10 }
0x1ea5   :  { %1554 = sbr.rel (%p3538_p6) target bundleno = 8837 (0x2285), region = 33 }
0x1ea8   :  { %v1543_v49 = vpop.permute.xlu1 %1542 }
0x1ea9   :  { %v1545_v51 = vmul.f32 %v1543_v49, %v1540_v48 }
0x1eab   :  { %v4814_v52 = vadd.f32 %v1546_v50, %v1545_v51 }
0x1ead   :  { %1556 = vrot.lane.b32.xlu0 %v4814_v52, %s4467_s20 }
0x1f1f   :  { %v1557_v53 = vpop.permute.xlu0 %1556 }
0x1f20   :  { %3907 = vmatmul.mubr.msk.f32.vlgmr.msra.gmra.mrb[0].mxu0 %vm321_vm4, %v1557_v53 }
0x1ff3   :  { %v1626_v57 = vpop.f32.mrb[0].mxu0 }
0x1ff4   :  { %v1627_v58 = vadd.f32 %v4575_v15, %v1626_v57  ;;  %v3908_v59 = vpop.f32.mrb[1].mxu0 }
0x1ff6   :  { %v1633_v60 = vsel %vm1632_vm12, %v1627_v58, -inf }
0x1ff7   :  { %1634 = vmax.xlane.f32.xlu0 %v1633_v60 }
0x2084   :  { %v1635_v63 = vpop.xlane.xlu0 %1634 }
0x2085   :  { %vm1636_vm13 = vcmp.eq.f32.partialorder %v1627_v58, %v1635_v63 }
0x2086   :  { %v1637_v1 = vsel %vm1636_vm13, %v1631_v61, 16 }
0x2087   :  { %v1638_v2 = vsel %vm1632_vm12, %v1637_v1, 2147483647 }
0x2088   :  { %v1640_v3 = vshra.s32 %v1638_v2, 16  ;;  %v1639_v14 = vand.u32 65535, %v1638_v2 }
0x208a   :  { %v1642_v4 = vcvt.s32.f32 %v1640_v3  ;;  %v1641_v6 = vcvt.s32.f32 %v1639_v14 }
0x208c   :  { %1643 = vmin.xlane.f32.xlu1 %v1642_v4 }
0x2119   :  { %v1644_v5 = vpop.xlane.xlu1 %1643 }
0x211a   :  { %vm1645_vm14 = vcmp.eq.f32.partialorder %v1642_v4, %v1644_v5  ;;  %v1650_v21 = vcvt.f32.s32 %v1644_v5 }
0x211b   :  { %v1646_v38 = vsel %vm1645_vm14, %v1641_v6, inf }
0x211c   :  { %1647 = vmin.xlane.f32.xlu1 %v1646_v38  ;;  %v1651_v17 = vshll.u32 %v1650_v21, 16 }
0x21a9   :  { %v1648_v13 = vpop.xlane.xlu1 %1647 }
0x21aa   :  { %v1649_v18 = vcvt.f32.s32 %v1648_v13 }
0x21ac   :  { %v1652_v19 = vadd.s32 %v1651_v17, %v1649_v18 }
0x21ae   :  { %vm1653_vm15 = vcmp.eq.s32.totalorder %v1631_v61, %v1652_v19 }
0x21af   :  { %v3540_v20 = vsel %vm1653_vm15, 1.0, %v4470_v56 }
0x21b0   :  { %3914 = vmatmul.mubr.msk.f32.vlgmr.msra.gmra.mrb[0].mxu1 %vm73_vm0, %v3540_v20 }
0x2283   :  { %v1725_v25 = vpop.f32.mrb[0].mxu1 }
0x2284   :  { %1729 = vst.msk [vmem:[#allocation2] sm:$0x3] %vm1158_vm2, %v1725_v25  ;;  %v3915_v27 = vpop.f32.mrb[1].mxu1 }
0x2285 PF:  { %1732 = vrot.lane.b32.xlu0 %v4814_v52, %s4462_s10  ;;  %4210 = vmatprep.subr.bf16.mxu0 %v4458_v16  ;;  %vm1832_vm5 = vcmask 785414   ;;  %s3544_s21 = sld [smem:[#allocation3 + $0x3]] }
0x2286   :  { %4212 = vmatpush3.bf16.msra.mxu0 %v4758_v12  ;;  %3924 = vmatprep.mubr.msk.f32.mxu0 %vm4459_vm1, %v4460_v22 }
0x2287   :  { %4213 = vmatprep.subr.bf16.mxu0 %v4458_v16 }
0x228a   :  { %4215 = vmatpush3.bf16.msra.mxu0 %v4764_v36 }
0x228b   :  { %v1730_v30 = vld [vmem:[#allocation2] sm:$0x3]  ;;  %p3545_p7 = scmp.ne.s32.totalorder %s3544_s21, 0 }
0x228c   :  { %1833 = vst.msk [vmem:[#allocation2 - $0x6] sm:$0xc0] %vm1832_vm5, %v4624_v34  ;;  %v4217_v54 = vpack.c.bf16 (!%p3545_p7), %v4555_v9, %v4550_v8  ;;  %s4471_s22 = smov (!%p3545_p7), 96   ;;  %v4472_v42 = vmov (!%p3545_p7), 0.0|0.0   ;;  %v4220_v55 = vpack.c.bf16 (!%p3545_p7), %v4565_v11, %v4560_v10  ;;  %vm4473_vm6 = vmmov (!%p3545_p7), 0  }
0x228d   :  { %4216 = vmatprep.subr.bf16.mxu0 (!%p3545_p7), %v4472_v42  ;;  %v4474_v56 = vmov (!%p3545_p7), 0.0   ;;  %4222 = vmatprep.subr.bf16.mxu1 (!%p3545_p7), %v4472_v42  ;;  %vm1916_vm7 = vcmask (!%p3545_p7), 123904   ;;  %v1915_v60 = vand.u32 (!%p3545_p7), 127, %v57_v23  ;;  %v4223_v38 = vpack.c.bf16 (!%p3545_p7), %v4660_v62, %v4662_v0 }
0x228e   :  { %3942 = vmatprep.mubr.msk.f32.mxu1 (!%p3545_p7), %vm4473_vm6, %v4474_v56 }
0x228f   :  { %4224 = vmatpush3.bf16.msra.mxu1 (!%p3545_p7), %v4223_v38 }
0x22f7   :  { %v4836_v28 = vpop.permute.xlu0 %1732 }
0x22f8   :  { %3925 = vmatmul.mubr.msk.f32.vlgmr.msra.gmra.mrb[0].mxu0 %vm321_vm4, %v4836_v28 }
0x22f9   :  { %4218 = vmatpush3.bf16.msra.mxu0 (!%p3545_p7), %v4217_v54  ;;  %3935 = vmatprep.mubr.msk.f32.mxu0 (!%p3545_p7), %vm4473_vm6, %v4474_v56 }
0x22fa   :  { %4219 = vmatprep.subr.bf16.mxu0 (!%p3545_p7), %v4472_v42 }
0x22fd   :  { %4221 = vmatpush3.bf16.msra.mxu0 (!%p3545_p7), %v4220_v55 }
0x23cb   :  { %v1802_v32 = vpop.f32.mrb[0].mxu0 }
0x23cc   :  { %v1803_v35 = vadd.f32 %v1802_v32, %v4773_v33  ;;  %v3926_v37 = vpop.f32.mrb[1].mxu0 }
0x23ce   :  { %1814 = vrot.lane.b32.xlu0 %v1803_v35, %s4461_s3  ;;  %v1806_v39 = vadd.f32 %v1803_v35, %v1730_v30 }
0x23d0   :  { %v3543_v43 = vmul.f32 -1.442695, %v1806_v39 }
0x23d2   :  { %4413 = vpow2.f32 %v3543_v43 }
0x23dc   :  { %v4414_v40 = vpop.eup %4413 }
0x23dd   :  { %v1810_v41 = vadd.f32 1.0, %v4414_v40 }
0x23df   :  { %4415 = vrcp.f32 %v1810_v41 }
0x23e9   :  { %v4416_v44 = vpop.eup %4415 }
0x23ea   :  { %v1824_v26 = vsub.f32 1.0, %v4416_v44  ;;  %v1830_v49 = vmul.f32 %v4416_v44, %v4814_v52 }
0x2440   :  { %v1815_v45 = vpop.permute.xlu0 %1814 }
0x2441   :  { %v1817_v46 = vmul.f32 %v4416_v44, %v1815_v45 }
0x2443   :  { %1819 = vrot.lane.b32.xlu1 %v1817_v46, %s4461_s3 }
0x24b5   :  { %v1820_v47 = vpop.permute.xlu1 %1819 }
0x24b6   :  { %v1822_v24 = vadd.f32 %v1820_v47, %v1730_v30 }
0x24b8   :  { %4417 = vtanh.f32 %v1822_v24 }
0x24c2   :  { %v4418_v34 = vpop.eup %4417 }
0x24c3   :  { %1826 = vrot.lane.b32.xlu1 %v4418_v34, %s4462_s10 }
0x2532   :  { %1838 = sbr.rel (%p3545_p7) target bundleno = 10514 (0x2912), region = 37 }
0x2535   :  { %v1827_v48 = vpop.permute.xlu1 %1826 }
0x2536   :  { %v1829_v50 = vmul.f32 %v1827_v48, %v1824_v26 }
0x2538   :  { %v4846_v51 = vadd.f32 %v1830_v49, %v1829_v50 }
0x253a   :  { %1840 = vrot.lane.b32.xlu0 %v4846_v51, %s4471_s22 }
0x25ac   :  { %v1841_v52 = vpop.permute.xlu0 %1840 }
0x25ad   :  { %3936 = vmatmul.mubr.msk.f32.vlgmr.msra.gmra.mrb[0].mxu0 %vm321_vm4, %v1841_v52 }
0x2680   :  { %v1910_v53 = vpop.f32.mrb[0].mxu0 }
0x2681   :  { %v1911_v57 = vadd.f32 %v4575_v15, %v1910_v53  ;;  %v3937_v58 = vpop.f32.mrb[1].mxu0 }
0x2683   :  { %v1917_v59 = vsel %vm1916_vm7, %v1911_v57, -inf }
0x2684   :  { %1918 = vmax.xlane.f32.xlu0 %v1917_v59 }
0x2711   :  { %v1919_v61 = vpop.xlane.xlu0 %1918 }
0x2712   :  { %vm1920_vm8 = vcmp.eq.f32.partialorder %v1911_v57, %v1919_v61 }
0x2713   :  { %v1921_v63 = vsel %vm1920_vm8, %v1915_v60, 16 }
0x2714   :  { %v1922_v1 = vsel %vm1916_vm7, %v1921_v63, 2147483647 }
0x2715   :  { %v1924_v2 = vshra.s32 %v1922_v1, 16  ;;  %v1923_v4 = vand.u32 65535, %v1922_v1 }
0x2717   :  { %v1926_v3 = vcvt.s32.f32 %v1924_v2  ;;  %v1925_v5 = vcvt.s32.f32 %v1923_v4 }
0x2719   :  { %1927 = vmin.xlane.f32.xlu1 %v1926_v3 }
0x27a6   :  { %v1928_v14 = vpop.xlane.xlu1 %1927 }
0x27a7   :  { %vm1929_vm9 = vcmp.eq.f32.partialorder %v1926_v3, %v1928_v14  ;;  %v1934_v7 = vcvt.f32.s32 %v1928_v14 }
0x27a8   :  { %v1930_v6 = vsel %vm1929_vm9, %v1925_v5, inf }
0x27a9   :  { %1931 = vmin.xlane.f32.xlu1 %v1930_v6  ;;  %v1935_v13 = vshll.u32 %v1934_v7, 16 }
0x2836   :  { %v1932_v21 = vpop.xlane.xlu1 %1931 }
0x2837   :  { %v1933_v17 = vcvt.f32.s32 %v1932_v21 }
0x2839   :  { %v1936_v18 = vadd.s32 %v1935_v13, %v1933_v17 }
0x283b   :  { %vm1937_vm11 = vcmp.eq.s32.totalorder %v1915_v60, %v1936_v18 }
0x283c   :  { %v3547_v19 = vsel %vm1937_vm11, 1.0, %v4474_v56 }
0x283d   :  { %3943 = vmatmul.mubr.msk.f32.vlgmr.msra.gmra.mrb[0].mxu1 %vm73_vm0, %v3547_v19 }
0x2910   :  { %v2009_v20 = vpop.f32.mrb[0].mxu1 }
0x2911   :  { %2013 = vst.msk [vmem:[#allocation2] sm:$0x3] %vm1158_vm2, %v2009_v20  ;;  %v3944_v25 = vpop.f32.mrb[1].mxu1 }
0x2912 PF:  { %2016 = vrot.lane.b32.xlu0 %v4846_v51, %s4462_s10  ;;  %4225 = vmatprep.subr.bf16.mxu0 %v4458_v16  ;;  %s3551_s23 = sld [smem:[#allocation3 + $0x4]] }
0x2913   :  { %4227 = vmatpush3.bf16.msra.mxu0 %v4758_v12  ;;  %3953 = vmatprep.mubr.msk.f32.mxu0 %vm4459_vm1, %v4460_v22 }
0x2914   :  { %4228 = vmatprep.subr.bf16.mxu0 %v4458_v16 }
0x2917   :  { %4230 = vmatpush3.bf16.msra.mxu0 %v4764_v36 }
0x2918   :  { %v2014_v27 = vld [vmem:[#allocation2] sm:$0x3]  ;;  %p3552_p8 = scmp.ne.s32.totalorder %s3551_s23, 0 }
0x2919   :  { %2116 = vst.msk [vmem:[#allocation2] sm:$0x3] %vm1158_vm2, %v4621_v31  ;;  %v4232_v42 = vpack.c.bf16 (!%p3552_p8), %v4555_v9, %v4550_v8  ;;  %s4475_s24 = smov (!%p3552_p8), 96   ;;  %v4476_v55 = vmov (!%p3552_p8), 0.0|0.0   ;;  %v4235_v56 = vpack.c.bf16 (!%p3552_p8), %v4565_v11, %v4560_v10  ;;  %vm4477_vm12 = vmmov (!%p3552_p8), 0  }
0x291a   :  { %4231 = vmatprep.subr.bf16.mxu0 (!%p3552_p8), %v4476_v55  ;;  %v4478_v52 = vmov (!%p3552_p8), 0.0   ;;  %4237 = vmatprep.subr.bf16.mxu1 (!%p3552_p8), %v4476_v55  ;;  %vm2199_vm13 = vcmask (!%p3552_p8), 123904   ;;  %v2198_v60 = vand.u32 (!%p3552_p8), 127, %v57_v23  ;;  %v4238_v38 = vpack.c.bf16 (!%p3552_p8), %v4660_v62, %v4662_v0 }
0x291b   :  { %3971 = vmatprep.mubr.msk.f32.mxu1 (!%p3552_p8), %vm4477_vm12, %v4478_v52 }
0x291c   :  { %4239 = vmatpush3.bf16.msra.mxu1 (!%p3552_p8), %v4238_v38 }
0x2984   :  { %v4870_v30 = vpop.permute.xlu0 %2016 }
0x2985   :  { %3954 = vmatmul.mubr.msk.f32.vlgmr.msra.gmra.mrb[0].mxu0 %vm321_vm4, %v4870_v30 }
0x2986   :  { %4233 = vmatpush3.bf16.msra.mxu0 (!%p3552_p8), %v4232_v42  ;;  %3964 = vmatprep.mubr.msk.f32.mxu0 (!%p3552_p8), %vm4477_vm12, %v4478_v52 }
0x2987   :  { %4234 = vmatprep.subr.bf16.mxu0 (!%p3552_p8), %v4476_v55 }
0x298a   :  { %4236 = vmatpush3.bf16.msra.mxu0 (!%p3552_p8), %v4235_v56 }
0x2a58   :  { %v2086_v32 = vpop.f32.mrb[0].mxu0 }
0x2a59   :  { %v2087_v35 = vadd.f32 %v2086_v32, %v4773_v33  ;;  %v3955_v37 = vpop.f32.mrb[1].mxu0 }
0x2a5b   :  { %2098 = vrot.lane.b32.xlu0 %v2087_v35, %s4461_s3  ;;  %v2090_v39 = vadd.f32 %v2087_v35, %v2014_v27 }
0x2a5d   :  { %v3550_v43 = vmul.f32 -1.442695, %v2090_v39 }
0x2a5f   :  { %4419 = vpow2.f32 %v3550_v43 }
0x2a69   :  { %v4420_v40 = vpop.eup %4419 }
0x2a6a   :  { %v2094_v41 = vadd.f32 1.0, %v4420_v40 }
0x2a6c   :  { %4421 = vrcp.f32 %v2094_v41 }
0x2a76   :  { %v4422_v44 = vpop.eup %4421 }
0x2a77   :  { %v2108_v26 = vsub.f32 1.0, %v4422_v44  ;;  %v2114_v49 = vmul.f32 %v4422_v44, %v4846_v51 }
0x2acd   :  { %v2099_v45 = vpop.permute.xlu0 %2098 }
0x2ace   :  { %v2101_v46 = vmul.f32 %v4422_v44, %v2099_v45 }
0x2ad0   :  { %2103 = vrot.lane.b32.xlu1 %v2101_v46, %s4461_s3 }
0x2b42   :  { %v2104_v47 = vpop.permute.xlu1 %2103 }
0x2b43   :  { %v2106_v24 = vadd.f32 %v2104_v47, %v2014_v27 }
0x2b45   :  { %4423 = vtanh.f32 %v2106_v24 }
0x2b4f   :  { %v4424_v34 = vpop.eup %4423 }
0x2b50   :  { %2110 = vrot.lane.b32.xlu1 %v4424_v34, %s4462_s10 }
0x2bbf   :  { %2121 = sbr.rel (%p3552_p8) target bundleno = 12191 (0x2f9f), region = 41 }
0x2bc2   :  { %v2111_v48 = vpop.permute.xlu1 %2110 }
0x2bc3   :  { %v2113_v50 = vmul.f32 %v2111_v48, %v2108_v26 }
0x2bc5   :  { %v4879_v54 = vadd.f32 %v2114_v49, %v2113_v50 }
0x2bc7   :  { %2123 = vrot.lane.b32.xlu0 %v4879_v54, %s4475_s24 }
0x2c39   :  { %v2124_v51 = vpop.permute.xlu0 %2123 }
0x2c3a   :  { %3965 = vmatmul.mubr.msk.f32.vlgmr.msra.gmra.mrb[0].mxu0 %vm321_vm4, %v2124_v51 }
0x2d0d   :  { %v2193_v53 = vpop.f32.mrb[0].mxu0 }
0x2d0e   :  { %v2194_v57 = vadd.f32 %v4575_v15, %v2193_v53  ;;  %v3966_v58 = vpop.f32.mrb[1].mxu0 }
0x2d10   :  { %v2200_v59 = vsel %vm2199_vm13, %v2194_v57, -inf }
0x2d11   :  { %2201 = vmax.xlane.f32.xlu0 %v2200_v59 }
0x2d9e   :  { %v2202_v61 = vpop.xlane.xlu0 %2201 }
0x2d9f   :  { %vm2203_vm14 = vcmp.eq.f32.partialorder %v2194_v57, %v2202_v61 }
0x2da0   :  { %v2204_v63 = vsel %vm2203_vm14, %v2198_v60, 16 }
0x2da1   :  { %v2205_v1 = vsel %vm2199_vm13, %v2204_v63, 2147483647 }
0x2da2   :  { %v2207_v2 = vshra.s32 %v2205_v1, 16  ;;  %v2206_v4 = vand.u32 65535, %v2205_v1 }
0x2da4   :  { %v2209_v3 = vcvt.s32.f32 %v2207_v2  ;;  %v2208_v5 = vcvt.s32.f32 %v2206_v4 }
0x2da6   :  { %2210 = vmin.xlane.f32.xlu1 %v2209_v3 }
0x2e33   :  { %v2211_v14 = vpop.xlane.xlu1 %2210 }
0x2e34   :  { %vm2212_vm15 = vcmp.eq.f32.partialorder %v2209_v3, %v2211_v14  ;;  %v2217_v7 = vcvt.f32.s32 %v2211_v14 }
0x2e35   :  { %v2213_v6 = vsel %vm2212_vm15, %v2208_v5, inf }
0x2e36   :  { %2214 = vmin.xlane.f32.xlu1 %v2213_v6  ;;  %v2218_v13 = vshll.u32 %v2217_v7, 16 }
0x2ec3   :  { %v2215_v21 = vpop.xlane.xlu1 %2214 }
0x2ec4   :  { %v2216_v17 = vcvt.f32.s32 %v2215_v21 }
0x2ec6   :  { %v2219_v18 = vadd.s32 %v2218_v13, %v2216_v17 }
0x2ec8   :  { %vm2220_vm5 = vcmp.eq.s32.totalorder %v2198_v60, %v2219_v18 }
0x2ec9   :  { %v3554_v19 = vsel %vm2220_vm5, 1.0, %v4478_v52 }
0x2eca   :  { %3972 = vmatmul.mubr.msk.f32.vlgmr.msra.gmra.mrb[0].mxu1 %vm73_vm0, %v3554_v19 }
0x2f9d   :  { %v2292_v20 = vpop.f32.mrb[0].mxu1 }
0x2f9e   :  { %2296 = vst.msk [vmem:[#allocation2] sm:$0x3] %vm1158_vm2, %v2292_v20  ;;  %v3973_v25 = vpop.f32.mrb[1].mxu1 }
0x2f9f PF:  { %2299 = vrot.lane.b32.xlu0 %v4879_v54, %s4462_s10  ;;  %4240 = vmatprep.subr.bf16.mxu0 %v4458_v16  ;;  %s3558_s25 = sld [smem:[#allocation3 + $0x5]] }
0x2fa0   :  { %4242 = vmatpush3.bf16.msra.mxu0 %v4758_v12  ;;  %3982 = vmatprep.mubr.msk.f32.mxu0 %vm4459_vm1, %v4460_v22 }
0x2fa1   :  { %4243 = vmatprep.subr.bf16.mxu0 %v4458_v16 }
0x2fa4   :  { %4245 = vmatpush3.bf16.msra.mxu0 %v4764_v36 }
0x2fa5   :  { %v2297_v27 = vld [vmem:[#allocation2] sm:$0x3]  ;;  %p3559_p9 = scmp.ne.s32.totalorder %s3558_s25, 0 }
0x2fa6   :  { %2399 = vst.msk [vmem:[#allocation2 - $0x2] sm:$0xc] %vm1264_vm3, %v4621_v31  ;;  %v4247_v56 = vpack.c.bf16 (!%p3559_p9), %v4555_v9, %v4550_v8  ;;  %s4479_s26 = smov (!%p3559_p9), 96   ;;  %v4480_v52 = vmov (!%p3559_p9), 0.0|0.0   ;;  %v4250_v51 = vpack.c.bf16 (!%p3559_p9), %v4565_v11, %v4560_v10  ;;  %vm4481_vm3 = vmmov (!%p3559_p9), 0  }
0x2fa7   :  { %4246 = vmatprep.subr.bf16.mxu0 (!%p3559_p9), %v4480_v52  ;;  %v4482_v53 = vmov (!%p3559_p9), 0.0   ;;  %4252 = vmatprep.subr.bf16.mxu1 (!%p3559_p9), %v4480_v52  ;;  %vm2482_vm6 = vcmask (!%p3559_p9), 123904   ;;  %v2481_v61 = vand.u32 (!%p3559_p9), 127, %v57_v23  ;;  %v4253_v7 = vpack.c.bf16 (!%p3559_p9), %v4660_v62, %v4662_v0 }
0x2fa8   :  { %4000 = vmatprep.mubr.msk.f32.mxu1 (!%p3559_p9), %vm4481_vm3, %v4482_v53 }
0x2fa9   :  { %4254 = vmatpush3.bf16.msra.mxu1 (!%p3559_p9), %v4253_v7 }
0x3011   :  { %v4903_v32 = vpop.permute.xlu0 %2299 }
0x3012   :  { %3983 = vmatmul.mubr.msk.f32.vlgmr.msra.gmra.mrb[0].mxu0 %vm321_vm4, %v4903_v32 }
0x3013   :  { %4248 = vmatpush3.bf16.msra.mxu0 (!%p3559_p9), %v4247_v56  ;;  %3993 = vmatprep.mubr.msk.f32.mxu0 (!%p3559_p9), %vm4481_vm3, %v4482_v53 }
0x3014   :  { %4249 = vmatprep.subr.bf16.mxu0 (!%p3559_p9), %v4480_v52 }
0x3017   :  { %4251 = vmatpush3.bf16.msra.mxu0 (!%p3559_p9), %v4250_v51 }
0x30e5   :  { %v2369_v35 = vpop.f32.mrb[0].mxu0 }
0x30e6   :  { %v2370_v37 = vadd.f32 %v2369_v35, %v4773_v33  ;;  %v3984_v39 = vpop.f32.mrb[1].mxu0 }
0x30e8   :  { %2381 = vrot.lane.b32.xlu0 %v2370_v37, %s4461_s3  ;;  %v2373_v43 = vadd.f32 %v2370_v37, %v2297_v27 }
0x30ea   :  { %v3557_v40 = vmul.f32 -1.442695, %v2373_v43 }
0x30ec   :  { %4425 = vpow2.f32 %v3557_v40 }
0x30f6   :  { %v4426_v41 = vpop.eup %4425 }
0x30f7   :  { %v2377_v44 = vadd.f32 1.0, %v4426_v41 }
0x30f9   :  { %4427 = vrcp.f32 %v2377_v44 }
0x3103   :  { %v4428_v45 = vpop.eup %4427 }
0x3104   :  { %v2391_v48 = vsub.f32 1.0, %v4428_v45  ;;  %v2397_v50 = vmul.f32 %v4428_v45, %v4879_v54 }
0x315a   :  { %v2382_v46 = vpop.permute.xlu0 %2381 }
0x315b   :  { %v2384_v47 = vmul.f32 %v4428_v45, %v2382_v46 }
0x315d   :  { %2386 = vrot.lane.b32.xlu1 %v2384_v47, %s4461_s3 }
0x31cf   :  { %v2387_v24 = vpop.permute.xlu1 %2386 }
0x31d0   :  { %v2389_v34 = vadd.f32 %v2387_v24, %v2297_v27 }
0x31d2   :  { %4429 = vtanh.f32 %v2389_v34 }
0x31dc   :  { %v4430_v26 = vpop.eup %4429 }
0x31dd   :  { %2393 = vrot.lane.b32.xlu1 %v4430_v26, %s4462_s10 }
0x324c   :  { %2404 = sbr.rel (%p3559_p9) target bundleno = 13868 (0x362c), region = 45 }
0x324f   :  { %v2394_v49 = vpop.permute.xlu1 %2393 }
0x3250   :  { %v2396_v42 = vmul.f32 %v2394_v49, %v2391_v48 }
0x3252   :  { %v4912_v55 = vadd.f32 %v2397_v50, %v2396_v42 }
0x3254   :  { %2406 = vrot.lane.b32.xlu0 %v4912_v55, %s4479_s26 }
0x32c6   :  { %v2407_v54 = vpop.permute.xlu0 %2406 }
0x32c7   :  { %3994 = vmatmul.mubr.msk.f32.vlgmr.msra.gmra.mrb[0].mxu0 %vm321_vm4, %v2407_v54 }
0x339a   :  { %v2476_v57 = vpop.f32.mrb[0].mxu0 }
0x339b   :  { %v2477_v58 = vadd.f32 %v4575_v15, %v2476_v57  ;;  %v3995_v59 = vpop.f32.mrb[1].mxu0 }
0x339d   :  { %v2483_v60 = vsel %vm2482_vm6, %v2477_v58, -inf }
0x339e   :  { %2484 = vmax.xlane.f32.xlu0 %v2483_v60 }
0x342b   :  { %v2485_v63 = vpop.xlane.xlu0 %2484 }
0x342c   :  { %vm2486_vm7 = vcmp.eq.f32.partialorder %v2477_v58, %v2485_v63 }
0x342d   :  { %v2487_v1 = vsel %vm2486_vm7, %v2481_v61, 16 }
0x342e   :  { %v2488_v2 = vsel %vm2482_vm6, %v2487_v1, 2147483647 }
0x342f   :  { %v2490_v3 = vshra.s32 %v2488_v2, 16  ;;  %v2489_v14 = vand.u32 65535, %v2488_v2 }
0x3431   :  { %v2492_v4 = vcvt.s32.f32 %v2490_v3  ;;  %v2491_v6 = vcvt.s32.f32 %v2489_v14 }
0x3433   :  { %2493 = vmin.xlane.f32.xlu1 %v2492_v4 }
0x34c0   :  { %v2494_v5 = vpop.xlane.xlu1 %2493 }
0x34c1   :  { %vm2495_vm8 = vcmp.eq.f32.partialorder %v2492_v4, %v2494_v5  ;;  %v2500_v21 = vcvt.f32.s32 %v2494_v5 }
0x34c2   :  { %v2496_v38 = vsel %vm2495_vm8, %v2491_v6, inf }
0x34c3   :  { %2497 = vmin.xlane.f32.xlu1 %v2496_v38  ;;  %v2501_v17 = vshll.u32 %v2500_v21, 16 }
0x3550   :  { %v2498_v13 = vpop.xlane.xlu1 %2497 }
0x3551   :  { %v2499_v18 = vcvt.f32.s32 %v2498_v13 }
0x3553   :  { %v2502_v19 = vadd.s32 %v2501_v17, %v2499_v18 }
0x3555   :  { %vm2503_vm9 = vcmp.eq.s32.totalorder %v2481_v61, %v2502_v19 }
0x3556   :  { %v3561_v20 = vsel %vm2503_vm9, 1.0, %v4482_v53 }
0x3557   :  { %4001 = vmatmul.mubr.msk.f32.vlgmr.msra.gmra.mrb[0].mxu1 %vm73_vm0, %v3561_v20 }
0x362a   :  { %v2575_v25 = vpop.f32.mrb[0].mxu1 }
0x362b   :  { %2579 = vst.msk [vmem:[#allocation2] sm:$0x3] %vm1158_vm2, %v2575_v25  ;;  %v4002_v27 = vpop.f32.mrb[1].mxu1 }
0x362c PF:  { %2582 = vrot.lane.b32.xlu0 %v4912_v55, %s4462_s10  ;;  %4255 = vmatprep.subr.bf16.mxu0 %v4458_v16  ;;  %s3565_s0 = sld [smem:[#allocation3 + $0x6]] }
0x362d   :  { %4257 = vmatpush3.bf16.msra.mxu0 %v4758_v12  ;;  %4011 = vmatprep.mubr.msk.f32.mxu0 %vm4459_vm1, %v4460_v22 }
0x362e   :  { %4258 = vmatprep.subr.bf16.mxu0 %v4458_v16 }
0x3631   :  { %4260 = vmatpush3.bf16.msra.mxu0 %v4764_v36 }
0x3632   :  { %v2580_v35 = vld [vmem:[#allocation2] sm:$0x3]  ;;  %p3566_p10 = scmp.ne.s32.totalorder %s3565_s0, 0 }
0x3633   :  { %2682 = vst.msk [vmem:[#allocation2 - $0x4] sm:$0x30] %vm1548_vm10, %v4621_v31  ;;  %v4262_v51 = vpack.c.bf16 (!%p3566_p10), %v4555_v9, %v4550_v8  ;;  %s4483_s27 = smov (!%p3566_p10), 96   ;;  %v4484_v53 = vmov (!%p3566_p10), 0.0|0.0   ;;  %v4265_v54 = vpack.c.bf16 (!%p3566_p10), %v4565_v11, %v4560_v10  ;;  %vm4485_vm10 = vmmov (!%p3566_p10), 0  }
0x3634   :  { %4261 = vmatprep.subr.bf16.mxu0 (!%p3566_p10), %v4484_v53  ;;  %v4486_v57 = vmov (!%p3566_p10), 0.0   ;;  %4267 = vmatprep.subr.bf16.mxu1 (!%p3566_p10), %v4484_v53  ;;  %vm2765_vm11 = vcmask (!%p3566_p10), 123904   ;;  %v2764_v63 = vand.u32 (!%p3566_p10), 127, %v57_v23  ;;  %v4268_v21 = vpack.c.bf16 (!%p3566_p10), %v4660_v62, %v4662_v0 }
0x3635   :  { %4029 = vmatprep.mubr.msk.f32.mxu1 (!%p3566_p10), %vm4485_vm10, %v4486_v57 }
0x3636   :  { %4269 = vmatpush3.bf16.msra.mxu1 (!%p3566_p10), %v4268_v21 }
0x369e   :  { %v4936_v37 = vpop.permute.xlu0 %2582 }
0x369f   :  { %4012 = vmatmul.mubr.msk.f32.vlgmr.msra.gmra.mrb[0].mxu0 %vm321_vm4, %v4936_v37 }
0x36a0   :  { %4263 = vmatpush3.bf16.msra.mxu0 (!%p3566_p10), %v4262_v51  ;;  %4022 = vmatprep.mubr.msk.f32.mxu0 (!%p3566_p10), %vm4485_vm10, %v4486_v57 }
0x36a1   :  { %4264 = vmatprep.subr.bf16.mxu0 (!%p3566_p10), %v4484_v53 }
0x36a4   :  { %4266 = vmatpush3.bf16.msra.mxu0 (!%p3566_p10), %v4265_v54 }
0x3772   :  { %v2652_v39 = vpop.f32.mrb[0].mxu0 }
0x3773   :  { %v2653_v43 = vadd.f32 %v2652_v39, %v4773_v33  ;;  %v4013_v40 = vpop.f32.mrb[1].mxu0 }
0x3775   :  { %2664 = vrot.lane.b32.xlu0 %v2653_v43, %s4461_s3  ;;  %v2656_v41 = vadd.f32 %v2653_v43, %v2580_v35 }
0x3777   :  { %v3564_v44 = vmul.f32 -1.442695, %v2656_v41 }
0x3779   :  { %4431 = vpow2.f32 %v3564_v44 }
0x3783   :  { %v4432_v45 = vpop.eup %4431 }
0x3784   :  { %v2660_v31 = vadd.f32 1.0, %v4432_v45 }
0x3786   :  { %4433 = vrcp.f32 %v2660_v31 }
0x3790   :  { %v4434_v46 = vpop.eup %4433 }
0x3791   :  { %v2674_v49 = vsub.f32 1.0, %v4434_v46  ;;  %v2680_v42 = vmul.f32 %v4434_v46, %v4912_v55 }
0x37e7   :  { %v2665_v47 = vpop.permute.xlu0 %2664 }
0x37e8   :  { %v2667_v24 = vmul.f32 %v4434_v46, %v2665_v47 }
0x37ea   :  { %2669 = vrot.lane.b32.xlu1 %v2667_v24, %s4461_s3 }
0x385c   :  { %v2670_v34 = vpop.permute.xlu1 %2669 }
0x385d   :  { %v2672_v26 = vadd.f32 %v2670_v34, %v2580_v35 }
0x385f   :  { %4435 = vtanh.f32 %v2672_v26 }
0x3869   :  { %v4436_v48 = vpop.eup %4435 }
0x386a   :  { %2676 = vrot.lane.b32.xlu1 %v4436_v48, %s4462_s10 }
0x38d9   :  { %2687 = sbr.rel (%p3566_p10) target bundleno = 15545 (0x3cb9), region = 49 }
0x38dc   :  { %v2677_v50 = vpop.permute.xlu1 %2676 }
0x38dd   :  { %v2679_v56 = vmul.f32 %v2677_v50, %v2674_v49 }
0x38df   :  { %v4945_v52 = vadd.f32 %v2680_v42, %v2679_v56 }
0x38e1   :  { %2689 = vrot.lane.b32.xlu0 %v4945_v52, %s4483_s27 }
0x3953   :  { %v2690_v55 = vpop.permute.xlu0 %2689 }
0x3954   :  { %4023 = vmatmul.mubr.msk.f32.vlgmr.msra.gmra.mrb[0].mxu0 %vm321_vm4, %v2690_v55 }
0x3a27   :  { %v2759_v58 = vpop.f32.mrb[0].mxu0 }
0x3a28   :  { %v2760_v59 = vadd.f32 %v4575_v15, %v2759_v58  ;;  %v4024_v60 = vpop.f32.mrb[1].mxu0 }
0x3a2a   :  { %v2766_v61 = vsel %vm2765_vm11, %v2760_v59, -inf }
0x3a2b   :  { %2767 = vmax.xlane.f32.xlu0 %v2766_v61 }
0x3ab8   :  { %v2768_v1 = vpop.xlane.xlu0 %2767 }
0x3ab9   :  { %vm2769_vm12 = vcmp.eq.f32.partialorder %v2760_v59, %v2768_v1 }
0x3aba   :  { %v2770_v2 = vsel %vm2769_vm12, %v2764_v63, 16 }
0x3abb   :  { %v2771_v3 = vsel %vm2765_vm11, %v2770_v2, 2147483647 }
0x3abc   :  { %v2773_v4 = vshra.s32 %v2771_v3, 16  ;;  %v2772_v5 = vand.u32 65535, %v2771_v3 }
0x3abe   :  { %v2775_v14 = vcvt.s32.f32 %v2773_v4  ;;  %v2774_v38 = vcvt.s32.f32 %v2772_v5 }
0x3ac0   :  { %2776 = vmin.xlane.f32.xlu1 %v2775_v14 }
0x3b4d   :  { %v2777_v6 = vpop.xlane.xlu1 %2776 }
0x3b4e   :  { %vm2778_vm13 = vcmp.eq.f32.partialorder %v2775_v14, %v2777_v6  ;;  %v2783_v13 = vcvt.f32.s32 %v2777_v6 }
0x3b4f   :  { %v2779_v7 = vsel %vm2778_vm13, %v2774_v38, inf }
0x3b50   :  { %2780 = vmin.xlane.f32.xlu1 %v2779_v7  ;;  %v2784_v23 = vshll.u32 %v2783_v13, 16 }
0x3bdd   :  { %v2781_v17 = vpop.xlane.xlu1 %2780 }
0x3bde   :  { %v2782_v18 = vcvt.f32.s32 %v2781_v17 }
0x3be0   :  { %v2785_v19 = vadd.s32 %v2784_v23, %v2782_v18 }
0x3be2   :  { %vm2786_vm14 = vcmp.eq.s32.totalorder %v2764_v63, %v2785_v19 }
0x3be3   :  { %v3568_v20 = vsel %vm2786_vm14, 1.0, %v4486_v57 }
0x3be4   :  { %4030 = vmatmul.mubr.msk.f32.vlgmr.msra.gmra.mrb[0].mxu1 %vm73_vm0, %v3568_v20 }
0x3cb7   :  { %v2858_v25 = vpop.f32.mrb[0].mxu1 }
0x3cb8   :  { %2862 = vst.msk [vmem:[#allocation2] sm:$0x3] %vm1158_vm2, %v2858_v25  ;;  %v4031_v27 = vpop.f32.mrb[1].mxu1 }
0x3cb9 PF:  { %2865 = vrot.lane.b32.xlu0 %v4945_v52, %s4462_s10  ;;  %4270 = vmatprep.subr.bf16.mxu0 %v4458_v16  ;;  %v4277_v62 = vpack.c.bf16 %v4555_v9, %v4550_v8  ;;  %v4280_v0 = vpack.c.bf16 %v4565_v11, %v4560_v10  ;;  %s4487_s4 = smov 16   ;;  %s4488_s28 = smov 48   ;;  %vm3492_vm2 = vcmask 523264   ;;  %vm3494_vm15 = vcmask 654336  }
0x3cba   :  { %4272 = vmatpush3.bf16.msra.mxu0 %v4758_v12  ;;  %4040 = vmatprep.mubr.msk.f32.mxu0 %vm4459_vm1, %v4460_v22  ;;  %s4489_s29 = smov 80   ;;  %s4490_s30 = smov 32   ;;  %vm3496_vm5 = vcmask 785408   ;;  %vm3498_vm3 = vcmask 916480  }
0x3cbb   :  { %4273 = vmatprep.subr.bf16.mxu0 %v4458_v16  ;;  %4276 = vmatprep.subr.bf16.mxu1 %v4458_v16  ;;  %s4491_s6 = smov 112  }
0x3cbc   :  { %4278 = vmatpush3.bf16.msra.mxu1 %v4277_v62  ;;  %4051 = vmatprep.mubr.msk.f32.mxu1 %vm4459_vm1, %v4460_v22 }
0x3cbd   :  { %4279 = vmatprep.subr.bf16.mxu1 %v4458_v16 }
0x3cbe   :  { %4275 = vmatpush3.bf16.msra.mxu0 %v4764_v36 }
0x3cbf   :  { %4282 = vmatprep.subr.bf16.mxu0 %v4458_v16  ;;  %v2863_v35 = vld [vmem:[#allocation2] sm:$0x3] }
0x3cc0   :  { %4281 = vmatpush3.bf16.msra.mxu1 %v4280_v0 }
0x3cc1   :  { %4288 = vmatprep.subr.bf16.mxu1 %v4458_v16 }
0x3cc3   :  { %4052 = vmatmul.mubr.msk.f32.vlgmr.msra.gmra.mrb[0].mxu1 %vm321_vm4, %v4803_v29 }
0x3cc4   :  { %4290 = vmatpush3.bf16.msra.mxu1 %v4277_v62  ;;  %4073 = vmatprep.mubr.msk.f32.mxu1 %vm4459_vm1, %v4460_v22 }
0x3cc5   :  { %4291 = vmatprep.subr.bf16.mxu1 %v4458_v16 }
0x3cc8   :  { %4293 = vmatpush3.bf16.msra.mxu1 %v4280_v0 }
0x3cc9   :  { %4300 = vmatprep.subr.bf16.mxu1 %v4458_v16 }
0x3ccb   :  { %4074 = vmatmul.mubr.msk.f32.vlgmr.msra.gmra.mrb[2].mxu1 %vm321_vm4, %v4870_v30 }
0x3ccc   :  { %4302 = vmatpush3.bf16.msra.mxu1 %v4277_v62  ;;  %4095 = vmatprep.mubr.msk.f32.mxu1 %vm4459_vm1, %v4460_v22 }
0x3ccd   :  { %4303 = vmatprep.subr.bf16.mxu1 %v4458_v16 }
0x3cd0   :  { %4305 = vmatpush3.bf16.msra.mxu1 %v4280_v0 }
0x3cd1   :  { %4312 = vmatprep.subr.bf16.mxu1 %v4458_v16 }
0x3cd3   :  { %4096 = vmatmul.mubr.msk.f32.vlgmr.msra.gmra.mrb[4].mxu1 %vm321_vm4, %v4936_v37 }
0x3cd4   :  { %4314 = vmatpush3.bf16.msra.mxu1 %v4277_v62  ;;  %4117 = vmatprep.mubr.msk.f32.mxu1 %vm4459_vm1, %v4460_v22 }
0x3cd5   :  { %4315 = vmatprep.subr.bf16.mxu1 %v4458_v16 }
0x3cd8   :  { %4317 = vmatpush3.bf16.msra.mxu1 %v4280_v0 }
0x3d2b   :  { %v2866_v8 = vpop.permute.xlu0 %2865 }
0x3d2c   :  { %4041 = vmatmul.mubr.msk.f32.vlgmr.msra.gmra.mrb[0].mxu0 %vm321_vm4, %v2866_v8 }
0x3d2d   :  { %4284 = vmatpush3.bf16.msra.mxu0 %v4277_v62  ;;  %4062 = vmatprep.mubr.msk.f32.mxu0 %vm4459_vm1, %v4460_v22 }
0x3d2e   :  { %4285 = vmatprep.subr.bf16.mxu0 %v4458_v16 }
0x3d31   :  { %4287 = vmatpush3.bf16.msra.mxu0 %v4280_v0 }
0x3d32   :  { %4294 = vmatprep.subr.bf16.mxu0 %v4458_v16 }
0x3d34   :  { %4063 = vmatmul.mubr.msk.f32.vlgmr.msra.gmra.mrb[2].mxu0 %vm321_vm4, %v4836_v28 }
0x3d35   :  { %4296 = vmatpush3.bf16.msra.mxu0 %v4277_v62  ;;  %4084 = vmatprep.mubr.msk.f32.mxu0 %vm4459_vm1, %v4460_v22 }
0x3d36   :  { %4297 = vmatprep.subr.bf16.mxu0 %v4458_v16 }
0x3d39   :  { %4299 = vmatpush3.bf16.msra.mxu0 %v4280_v0 }
0x3d3a   :  { %4306 = vmatprep.subr.bf16.mxu0 %v4458_v16 }
0x3d3c   :  { %4085 = vmatmul.mubr.msk.f32.vlgmr.msra.gmra.mrb[4].mxu0 %vm321_vm4, %v4903_v32 }
0x3d3d   :  { %4308 = vmatpush3.bf16.msra.mxu0 %v4277_v62  ;;  %4106 = vmatprep.mubr.msk.f32.mxu0 %vm4459_vm1, %v4460_v22  ;;  %vm3490_vm1 = vcmask 392192  }
0x3d3e   :  { %4309 = vmatprep.subr.bf16.mxu0 %v4458_v16 }
0x3d41   :  { %4311 = vmatpush3.bf16.msra.mxu0 %v4280_v0 }
0x3d44   :  { %4107 = vmatmul.mubr.msk.f32.vlgmr.msra.gmra.mrb[6].mxu0 %vm321_vm4, %v2866_v8 }
0x3d96   :  { %v3031_v45 = vpop.f32.mrb[0].mxu1 }
0x3d97   :  { %v4053_v31 = vpop.f32.mrb[1].mxu1  ;;  %v3032_v48 = vadd.f32 %v4575_v15, %v3031_v45 }
0x3d9e   :  { %v3171_v46 = vpop.f32.mrb[2].mxu1 }
0x3d9f   :  { %v4075_v47 = vpop.f32.mrb[3].mxu1  ;;  %v3172_v49 = vadd.f32 %v4575_v15, %v3171_v46 }
0x3da6   :  { %v3311_v24 = vpop.f32.mrb[4].mxu1 }
0x3da7   :  { %v4097_v34 = vpop.f32.mrb[5].mxu1  ;;  %v3312_v50 = vadd.f32 %v4575_v15, %v3311_v24 }
0x3dff   :  { %v2935_v9 = vpop.f32.mrb[0].mxu0 }
0x3e00   :  { %v2936_v10 = vadd.f32 %v2935_v9, %v4773_v33  ;;  %v4042_v11 = vpop.f32.mrb[1].mxu0 }
0x3e02   :  { %2947 = vrot.lane.b32.xlu0 %v2936_v10, %s4461_s3  ;;  %v2939_v37 = vadd.f32 %v2936_v10, %v2863_v35 }
0x3e04   :  { %v3571_v22 = vmul.f32 -1.442695, %v2939_v37 }
0x3e06   :  { %4437 = vpow2.f32 %v3571_v22 }
0x3e07   :  { %v3101_v12 = vpop.f32.mrb[2].mxu0 }
0x3e08   :  { %v4064_v36 = vpop.f32.mrb[3].mxu0  ;;  %v3102_v57 = vadd.f32 %v4575_v15, %v3101_v12 }
0x3e0f   :  { %v3241_v29 = vpop.f32.mrb[4].mxu0 }
0x3e10   :  { %v4086_v28 = vpop.f32.mrb[5].mxu0  ;;  %v4438_v16 = vpop.eup %4437  ;;  %v3242_v55 = vadd.f32 %v4575_v15, %v3241_v29 }
0x3e11   :  { %v2943_v39 = vadd.f32 1.0, %v4438_v16 }
0x3e13   :  { %4439 = vrcp.f32 %v2943_v39 }
0x3e17   :  { %v3381_v30 = vpop.f32.mrb[6].mxu0 }
0x3e18   :  { %v4108_v32 = vpop.f32.mrb[7].mxu0  ;;  %v3382_v58 = vadd.f32 %v4575_v15, %v3381_v30 }
0x3e1d   :  { %v4440_v43 = vpop.eup %4439 }
0x3e1e   :  { %v2957_v42 = vsub.f32 1.0, %v4440_v43  ;;  %v2963_v53 = vmul.f32 %v4440_v43, %v4945_v52 }
0x3e74   :  { %v2948_v40 = vpop.permute.xlu0 %2947 }
0x3e75   :  { %v2950_v41 = vmul.f32 %v4440_v43, %v2948_v40 }
0x3e77   :  { %2952 = vrot.lane.b32.xlu1 %v2950_v41, %s4461_s3 }
0x3ee9   :  { %v2953_v33 = vpop.permute.xlu1 %2952 }
0x3eea   :  { %v2955_v44 = vadd.f32 %v2953_v33, %v2863_v35 }
0x3eec   :  { %4441 = vtanh.f32 %v2955_v44 }
0x3ef6   :  { %v4442_v26 = vpop.eup %4441 }
0x3ef7   :  { %2959 = vrot.lane.b32.xlu1 %v4442_v26, %s4462_s10 }
0x3efb   :  { %3461 = vrot.lane.b32.xlu1 %v3032_v48, %s4487_s4 }
0x3eff   :  { %3469 = vrot.lane.b32.xlu1 %v3172_v49, %s4488_s28 }
0x3f03   :  { %3477 = vrot.lane.b32.xlu1 %v3312_v50, %s4489_s29 }
0x3f69   :  { %v2960_v56 = vpop.permute.xlu1 %2959 }
0x3f6a   :  { %v2962_v51 = vmul.f32 %v2960_v56, %v2957_v42 }
0x3f6c   :  { %v2964_v54 = vadd.f32 %v2963_v53, %v2962_v51 }
0x3f6d   :  { %v3462_v63 = vpop.permute.xlu1 %3461 }
0x3f6e   :  { %3386 = vrot.lane.b32.xlu0 %v2964_v54, %s4462_s10  ;;  %v3488_v1 = vsel %vm73_vm0, 0.0, %v3462_v63 }
0x3f71   :  { %v3470_v4 = vpop.permute.xlu1 %3469 }
0x3f72   :  { %3465 = vrot.lane.b32.xlu0 %v3102_v57, %s4490_s30 }
0x3f75   :  { %v3478_v38 = vpop.permute.xlu1 %3477 }
0x3f76   :  { %3473 = vrot.lane.b32.xlu0 %v3242_v55, %s4461_s3 }
0x3f7a   :  { %3481 = vrot.lane.b32.xlu0 %v3382_v58, %s4462_s10 }
0x3fe0   :  { %v3387_v59 = vpop.permute.xlu0 %3386 }
0x3fe1   :  { %4118 = vmatmul.mubr.msk.f32.vlgmr.msra.gmra.mrb[6].mxu1 %vm321_vm4, %v3387_v59 }
0x3fe4   :  { %v3466_v2 = vpop.permute.xlu0 %3465 }
0x3fe5   :  { %v3489_v3 = vsel %vm321_vm4, %v3488_v1, %v3466_v2 }
0x3fe6   :  { %v3491_v14 = vsel %vm3490_vm1, %v3489_v3, %v3470_v4 }
0x3fe8   :  { %v3474_v5 = vpop.permute.xlu0 %3473 }
0x3fe9   :  { %v3493_v6 = vsel %vm3492_vm2, %v3491_v14, %v3474_v5 }
0x3fea   :  { %v3495_v7 = vsel %vm3494_vm15, %v3493_v6, %v3478_v38 }
0x40b4   :  { %v3456_v60 = vpop.f32.mrb[6].mxu1 }
0x40b5   :  { %v3457_v52 = vadd.f32 %v4575_v15, %v3456_v60  ;;  %v4119_v61 = vpop.f32.mrb[7].mxu1  ;;  %v3482_v15 = vpop.permute.xlu0 %3481 }
0x40b6   :  { %v3497_v21 = vsel %vm3496_vm5, %v3495_v7, %v3482_v15 }
0x40b7   :  { %3485 = vrot.lane.b32.xlu1 %v3457_v52, %s4491_s6 }
0x4129   :  { %v3486_v13 = vpop.permute.xlu1 %3485 }
0x412a   :  { %v3499_v17 = vsel %vm3498_vm3, %v3497_v21, %v3486_v13 }
0x412b   :  { %3500 = vst [vmem:[%s5037_s5] sm:$0x3] %v3499_v17 }
0x412c   :  { %3505 = vsyncpa [#allocation4], 1 }

</bundles_post_ra>
